<compile_context>
chip_gen: v6e
topology: v6e:2x2x1
jax: 0.10.0
libtpu: 0.0.40
codegen_flags: <defaults>
</compile_context>

<pallas_src>
import math

import jax
import jax.numpy as jnp
from jax.experimental import pallas as pl
from jax.experimental.pallas import tpu as pltpu

# ---------------- synthetic BERT config ----------------
VOCAB = 100
HIDDEN = 32
N_LAYERS = 2
N_HEADS = 4
HEAD_DIM = HIDDEN // N_HEADS
INTERMEDIATE = 64
MAX_POS = 16
TYPE_VOCAB = 2
NUM_CLASSES = 4
LN_EPS = 1e-12

BATCH = 2
SEQ = 8

_SCALE = 1.0 / math.sqrt(HEAD_DIM)
LANES = 128

# ---- weight-matrix slab row layout (each matrix zero-padded to 128 lanes) ----
W_QKV = 0                                   # (H, 3H)   fused Wq|Wk|Wv (Wq pre-scaled)
W_O = HIDDEN                                # (H, H)
W_FF1 = 2 * HIDDEN                          # (H, I)
W_FF2 = 3 * HIDDEN                          # (I, H)
W_LAYER_ROWS = 3 * HIDDEN + INTERMEDIATE    # 160 rows / layer
W_POOL = N_LAYERS * W_LAYER_ROWS            # (H, H)
W_FC = W_POOL + HIDDEN                      # (H, C)
W_ROWS = W_FC + HIDDEN                      # 384

# ---- bias/LN vector slab row layout (one row per vector, 128 lanes) ----
V_EMB_G, V_EMB_B = 0, 1
V_LAYER_BASE = 2
V_BQKV, V_BO, V_LN1G, V_LN1B, V_B1, V_B2, V_LN2G, V_LN2B = range(8)
V_LAYER_ROWS = 8
V_POOL_B = V_LAYER_BASE + N_LAYERS * V_LAYER_ROWS     # 18
V_FC_B = V_POOL_B + 1                                 # 19
V_ROWS = V_FC_B + 1                                   # 20


def _vmem():
    # whole array resident in VMEM (no tiling: everything is tiny)
    return pl.BlockSpec(memory_space=pltpu.MemorySpace.VMEM)


def _layernorm(v, g, b):
    # two-pass (x-mean)^2 variance (more robust than E[x^2]-mean^2), rsqrt on EUP
    mu = jnp.mean(v, axis=-1, keepdims=True)
    c = v - mu
    var = jnp.mean(c * c, axis=-1, keepdims=True)
    return c * jax.lax.rsqrt(var + LN_EPS) * g + b


# ---------------- fused kernel: LN(emb) -> 2 encoder layers -> pooler -> fc ----------------
def fused_bert_kernel(x_ref, mask_ref, wmat_ref, wvec_ref, out_ref):
    f32 = jnp.float32
    H, S, B, NH, hd, I = HIDDEN, SEQ, BATCH, N_HEADS, HEAD_DIM, INTERMEDIATE

    def vec(row, width):                     # (1, width) bias / LN vector
        return wvec_ref[row:row + 1, 0:width]

    def mat(row, nrows):                     # (nrows, 128) lane-dense weight block
        return wmat_ref[row:row + nrows, :]

    x = _layernorm(x_ref[...], vec(V_EMB_G, H), vec(V_EMB_B, H))      # (B*S, H)

    # additive mask bias, broadcast ONCE in-kernel to the stacked (B*NH*S, S) layout.
    # (a fully-masked key row degenerates to uniform attention; CLS is never masked)
    neg = (1.0 - mask_ref[...]) * -1e9                                # (B, S)
    mask_stacked = jnp.concatenate(
        [jnp.broadcast_to(neg[b:b + 1, :], (NH * S, S)) for b in range(B)], axis=0)

    for l in range(N_LAYERS):                                         # static unrolled
        wbase = l * W_LAYER_ROWS
        vbase = V_LAYER_BASE + l * V_LAYER_ROWS

        # ---- fused QKV projection: one lane-dense matmul (scale folded into Wq/bq) ----
        qkv = jnp.dot(x, mat(wbase + W_QKV, H),
                      preferred_element_type=f32)[:, :3 * H] + vec(vbase + V_BQKV, 3 * H)
        q, k, v = qkv[:, :H], qkv[:, H:2 * H], qkv[:, 2 * H:3 * H]

        # ---- stacked (B*NH*S, S) score tile, built in registers (no scratch) ----
        batch_blocks = []
        for b in range(B):
            r0 = b * S
            head_blocks = []
            for h in range(NH):
                c0 = h * hd
                head_blocks.append(jax.lax.dot_general(
                    q[r0:r0 + S, c0:c0 + hd], k[r0:r0 + S, c0:c0 + hd],
                    (((1,), (1,)), ((), ())), preferred_element_type=f32))
            batch_blocks.append(jnp.concatenate(head_blocks, axis=0))
        scores = jnp.concatenate(batch_blocks, axis=0) + mask_stacked

        # single masked softmax over the whole stacked tile
        m = jnp.max(scores, axis=-1, keepdims=True)
        p = jnp.exp(scores - m)
        denom = jnp.sum(p, axis=-1, keepdims=True)
        p = p * pl.reciprocal(denom, approx=True)      # divide on the EUP slot

        # ---- context: concat heads along lanes, batches along sublanes -> (B*S, H) ----
        ctx_rows = []
        for b in range(B):
            r0 = b * S
            heads = []
            for h in range(NH):
                row = (b * NH + h) * S
                heads.append(jnp.dot(p[row:row + S, :], v[r0:r0 + S, h * hd:(h + 1) * hd],
                                     preferred_element_type=f32))
            ctx_rows.append(jnp.concatenate(heads, axis=1))           # (S, H)
        ctx = jnp.concatenate(ctx_rows, axis=0)                       # (B*S, H)

        # single output projection against the unsplit Wo, bias added once
        attn = jnp.dot(ctx, mat(wbase + W_O, H),
                       preferred_element_type=f32)[:, :H] + vec(vbase + V_BO, H)
        x = _layernorm(x + attn, vec(vbase + V_LN1G, H), vec(vbase + V_LN1B, H))

        # ---- feed-forward ----
        h1 = jnp.dot(x, mat(wbase + W_FF1, H),
                     preferred_element_type=f32)[:, :I] + vec(vbase + V_B1, I)
        # TODO(synk): HF BERT uses erf-GELU; tanh approximation kept (Mosaic-safe).
        h1 = jax.nn.gelu(h1, approximate=True)
        ffn = jnp.dot(h1, mat(wbase + W_FF2, I),
                      preferred_element_type=f32)[:, :H] + vec(vbase + V_B2, H)
        x = _layernorm(x + ffn, vec(vbase + V_LN2G, H), vec(vbase + V_LN2B, H))

    # ---- pooler (tanh) + classifier on the B [CLS] rows only; single (B, C) store ----
    cls = jnp.concatenate([x[b * S:b * S + 1, :] for b in range(B)], axis=0)   # (B, H)
    pooled = jnp.tanh(jnp.dot(cls, mat(W_POOL, H),
                              preferred_element_type=f32)[:, :H] + vec(V_POOL_B, H))
    logits = jnp.dot(pooled, mat(W_FC, H),
                     preferred_element_type=f32)[:, :NUM_CLASSES] + vec(V_FC_B, NUM_CLASSES)
    out_ref[...] = logits                     # Dropout(0.1) is identity at inference


# ---------------- wrapper-side weight packing (layout plumbing, done once) ----------------
def pack_params(params):
    wmat = jnp.zeros((W_ROWS, LANES), jnp.float32)
    wvec = jnp.zeros((V_ROWS, LANES), jnp.float32)

    def put_m(slab, row, w):
        return slab.at[row:row + w.shape[0], 0:w.shape[1]].set(w)

    def put_v(slab, row, v):
        v = jnp.reshape(v, (-1,))
        return slab.at[row, 0:v.shape[0]].set(v)

    wvec = put_v(wvec, V_EMB_G, params["emb_ln_g"])
    wvec = put_v(wvec, V_EMB_B, params["emb_ln_b"])
    for l, lp in enumerate(params["layers"]):
        wb = l * W_LAYER_ROWS
        vb = V_LAYER_BASE + l * V_LAYER_ROWS
        # fold 1/sqrt(head_dim) into Wq / bq at pack time
        wqkv = jnp.concatenate([lp["wq"] * _SCALE, lp["wk"], lp["wv"]], axis=1)   # (H, 3H)
        bqkv = jnp.concatenate([lp["bq"] * _SCALE, lp["bk"], lp["bv"]], axis=1)   # (1, 3H)
        wmat = put_m(wmat, wb + W_QKV, wqkv)
        wmat = put_m(wmat, wb + W_O, lp["wo"])
        wmat = put_m(wmat, wb + W_FF1, lp["w1"])
        wmat = put_m(wmat, wb + W_FF2, lp["w2"])
        wvec = put_v(wvec, vb + V_BQKV, bqkv)
        wvec = put_v(wvec, vb + V_BO, lp["bo"])
        wvec = put_v(wvec, vb + V_LN1G, lp["ln1_g"])
        wvec = put_v(wvec, vb + V_LN1B, lp["ln1_b"])
        wvec = put_v(wvec, vb + V_B1, lp["b1"])
        wvec = put_v(wvec, vb + V_B2, lp["b2"])
        wvec = put_v(wvec, vb + V_LN2G, lp["ln2_g"])
        wvec = put_v(wvec, vb + V_LN2B, lp["ln2_b"])
    wmat = put_m(wmat, W_POOL, params["pooler_w"])
    wmat = put_m(wmat, W_FC, params["fc_w"])
    wvec = put_v(wvec, V_POOL_B, params["pooler_b"])
    wvec = put_v(wvec, V_FC_B, params["fc_b"])
    return {"wmat": wmat, "wvec": wvec}


# ---------------- parameters (deterministic synthetic init) ----------------
def init_params(key):
    def dense(k, fi, fo):
        return jax.random.normal(k, (fi, fo), jnp.float32) * 0.02

    keys = iter(jax.random.split(key, 8 + N_LAYERS * 8))
    params = {
        "word_emb": dense(next(keys), VOCAB, HIDDEN),
        "pos_emb": dense(next(keys), MAX_POS, HIDDEN),
        "type_emb": dense(next(keys), TYPE_VOCAB, HIDDEN),
        "emb_ln_g": jnp.ones((1, HIDDEN), jnp.float32),
        "emb_ln_b": jnp.zeros((1, HIDDEN), jnp.float32),
        "pooler_w": dense(next(keys), HIDDEN, HIDDEN),
        "pooler_b": jnp.zeros((1, HIDDEN), jnp.float32),
        "fc_w": dense(next(keys), HIDDEN, NUM_CLASSES),
        "fc_b": jnp.zeros((1, NUM_CLASSES), jnp.float32),
        "layers": [],
    }
    for _ in range(N_LAYERS):
        lp = {
            "wq": dense(next(keys), HIDDEN, HIDDEN),
            "bq": jnp.zeros((1, HIDDEN), jnp.float32),
            "wk": dense(next(keys), HIDDEN, HIDDEN),
            "bk": jnp.zeros((1, HIDDEN), jnp.float32),
            "wv": dense(next(keys), HIDDEN, HIDDEN),
            "bv": jnp.zeros((1, HIDDEN), jnp.float32),
            "wo": dense(next(keys), HIDDEN, HIDDEN),
            "bo": jnp.zeros((1, HIDDEN), jnp.float32),
            "ln1_g": jnp.ones((1, HIDDEN), jnp.float32),
            "ln1_b": jnp.zeros((1, HIDDEN), jnp.float32),
            "w1": dense(next(keys), HIDDEN, INTERMEDIATE),
            "b1": jnp.zeros((1, INTERMEDIATE), jnp.float32),
            "w2": dense(next(keys), INTERMEDIATE, HIDDEN),
            "b2": jnp.zeros((1, HIDDEN), jnp.float32),
            "ln2_g": jnp.ones((1, HIDDEN), jnp.float32),
            "ln2_b": jnp.zeros((1, HIDDEN), jnp.float32),
        }
        params["layers"].append(lp)
    return params


# ---------------- full forward (== BertClassifier.forward, eval mode) ----------------
def bert_classifier_forward(params, packed, input_ids, attention_mask):
    B, S = input_ids.shape
    assert (B, S) == (BATCH, SEQ)
    # embedding lookup: plain-JAX gather (glue); token_type_ids assumed all zero
    x = (params["word_emb"][input_ids]
         + params["pos_emb"][jnp.arange(S)][None, :, :]
         + params["type_emb"][0][None, None, :]).astype(jnp.float32)
    x_flat = x.reshape(B * S, HIDDEN)
    mask_f = attention_mask.astype(jnp.float32)          # raw (B, S); expanded in-kernel

    args = (x_flat, mask_f, packed["wmat"], packed["wvec"])
    return pl.pallas_call(
        fused_bert_kernel,
        out_shape=jax.ShapeDtypeStruct((B, NUM_CLASSES), jnp.float32),
        in_specs=[_vmem()] * len(args),
        out_specs=_vmem(),
    )(*args)


if __name__ == "__main__":
    key = jax.random.PRNGKey(0)
    k_param, k_ids = jax.random.split(key)

    params = init_params(k_param)
    packed = pack_params(params)   # one-time layout plumbing outside the kernel

    input_ids = jax.random.randint(k_ids, (BATCH, SEQ), 0, VOCAB, dtype=jnp.int32)
    attention_mask = jnp.array([[1, 1, 1, 1, 1, 1, 1, 1],
                                [1, 1, 1, 1, 1, 0, 0, 0]], dtype=jnp.int32)

    logits = bert_classifier_forward(params, packed, input_ids, attention_mask)
    logits = jax.block_until_ready(logits)
    assert logits.shape == (BATCH, NUM_CLASSES)
    print("KERNEL_OK")
</pallas_src>

<mosaic_0001>
module attributes {stable_mosaic.version = 11 : i64} {
  func.func @fused_bert_kernel(%arg0: memref<16x32xf32, #tpu.memory_space<vmem>>, %arg1: memref<2x8xf32, #tpu.memory_space<vmem>>, %arg2: memref<384x128xf32, #tpu.memory_space<vmem>>, %arg3: memref<20x128xf32, #tpu.memory_space<vmem>>, %arg4: memref<2x4xf32, #tpu.memory_space<vmem>>) attributes {dimension_semantics = [], scalar_prefetch = 0 : i64, scratch_operands = 0 : i64, tpu.core_type = #tpu.core_type<tc>} {
    %c0 = arith.constant 0 : index
    %c0_0 = arith.constant 0 : index
    %0 = vector.load %arg0[%c0, %c0_0] : memref<16x32xf32, #tpu.memory_space<vmem>>, vector<16x32xf32>
    %c0_1 = arith.constant 0 : index
    %c0_2 = arith.constant 0 : index
    %1 = vector.load %arg3[%c0_1, %c0_2] : memref<20x128xf32, #tpu.memory_space<vmem>>, vector<1x32xf32>
    %c1 = arith.constant 1 : index
    %c0_3 = arith.constant 0 : index
    %2 = vector.load %arg3[%c1, %c0_3] : memref<20x128xf32, #tpu.memory_space<vmem>>, vector<1x32xf32>
    %cst = arith.constant dense<0.000000e+00> : vector<16xf32>
    %3 = vector.multi_reduction <add>, %0, %cst [1] : vector<16x32xf32> to vector<16xf32>
    %4 = vector.shape_cast %3 : vector<16xf32> to vector<16x1xf32>
    %cst_4 = arith.constant 3.200000e+01 : f32
    %5 = vector.broadcast %cst_4 : f32 to vector<16x1xf32>
    %6 = arith.divf %4, %5 : vector<16x1xf32>
    %7 = vector.broadcast %6 : vector<16x1xf32> to vector<16x32xf32>
    %8 = arith.subf %0, %7 : vector<16x32xf32>
    %9 = arith.mulf %8, %8 : vector<16x32xf32>
    %cst_5 = arith.constant dense<0.000000e+00> : vector<16xf32>
    %10 = vector.multi_reduction <add>, %9, %cst_5 [1] : vector<16x32xf32> to vector<16xf32>
    %11 = vector.shape_cast %10 : vector<16xf32> to vector<16x1xf32>
    %cst_6 = arith.constant 3.200000e+01 : f32
    %12 = vector.broadcast %cst_6 : f32 to vector<16x1xf32>
    %13 = arith.divf %11, %12 : vector<16x1xf32>
    %cst_7 = arith.constant 9.99999996E-13 : f32
    %14 = vector.broadcast %cst_7 : f32 to vector<16x1xf32>
    %15 = arith.addf %13, %14 : vector<16x1xf32>
    %16 = math.rsqrt %15 : vector<16x1xf32>
    %17 = vector.broadcast %16 : vector<16x1xf32> to vector<16x32xf32>
    %18 = arith.mulf %8, %17 : vector<16x32xf32>
    %19 = vector.broadcast %1 : vector<1x32xf32> to vector<16x32xf32>
    %20 = arith.mulf %18, %19 : vector<16x32xf32>
    %21 = vector.broadcast %2 : vector<1x32xf32> to vector<16x32xf32>
    %22 = arith.addf %20, %21 : vector<16x32xf32>
    %c0_8 = arith.constant 0 : index
    %c0_9 = arith.constant 0 : index
    %23 = vector.load %arg1[%c0_8, %c0_9] : memref<2x8xf32, #tpu.memory_space<vmem>>, vector<2x8xf32>
    %cst_10 = arith.constant 1.000000e+00 : f32
    %24 = vector.broadcast %cst_10 : f32 to vector<2x8xf32>
    %25 = arith.subf %24, %23 : vector<2x8xf32>
    %cst_11 = arith.constant -1.000000e+09 : f32
    %26 = vector.broadcast %cst_11 : f32 to vector<2x8xf32>
    %27 = arith.mulf %25, %26 : vector<2x8xf32>
    %28 = vector.extract_strided_slice %27 {offsets = [0, 0], sizes = [1, 8], strides = [1, 1]} : vector<2x8xf32> to vector<1x8xf32>
    %29 = vector.shape_cast %28 : vector<1x8xf32> to vector<1x8xf32>
    %30 = vector.broadcast %29 : vector<1x8xf32> to vector<32x8xf32>
    %31 = vector.extract_strided_slice %27 {offsets = [1, 0], sizes = [1, 8], strides = [1, 1]} : vector<2x8xf32> to vector<1x8xf32>
    %32 = vector.shape_cast %31 : vector<1x8xf32> to vector<1x8xf32>
    %33 = vector.broadcast %32 : vector<1x8xf32> to vector<32x8xf32>
    %34 = tpu.concatenate %30, %33 in 0 : vector<32x8xf32>, vector<32x8xf32> -> vector<64x8xf32>
    %c0_12 = arith.constant 0 : index
    %c0_13 = arith.constant 0 : index
    %35 = vector.load %arg2[%c0_12, %c0_13] : memref<384x128xf32, #tpu.memory_space<vmem>>, vector<32x128xf32>
    %cst_14 = arith.constant dense<0.000000e+00> : vector<16x128xf32>
    %36 = tpu.matmul %22, %35, %cst_14 {dimension_numbers = #tpu.dot_dimension_numbers<[1], [0], [0], [1], [0, 0, 1, 1], [], []>} : vector<16x32xf32>, vector<32x128xf32>, vector<16x128xf32> -> vector<16x128xf32>
    %37 = vector.extract_strided_slice %36 {offsets = [0, 0], sizes = [16, 96], strides = [1, 1]} : vector<16x128xf32> to vector<16x96xf32>
    %c2 = arith.constant 2 : index
    %c0_15 = arith.constant 0 : index
    %38 = vector.load %arg3[%c2, %c0_15] : memref<20x128xf32, #tpu.memory_space<vmem>>, vector<1x96xf32>
    %39 = vector.broadcast %38 : vector<1x96xf32> to vector<16x96xf32>
    %40 = arith.addf %37, %39 : vector<16x96xf32>
    %41 = vector.extract_strided_slice %40 {offsets = [0, 0], sizes = [16, 32], strides = [1, 1]} : vector<16x96xf32> to vector<16x32xf32>
    %42 = vector.extract_strided_slice %40 {offsets = [0, 32], sizes = [16, 32], strides = [1, 1]} : vector<16x96xf32> to vector<16x32xf32>
    %43 = vector.extract_strided_slice %40 {offsets = [0, 64], sizes = [16, 32], strides = [1, 1]} : vector<16x96xf32> to vector<16x32xf32>
    %44 = vector.extract_strided_slice %41 {offsets = [0, 0], sizes = [8, 8], strides = [1, 1]} : vector<16x32xf32> to vector<8x8xf32>
    %45 = vector.extract_strided_slice %42 {offsets = [0, 0], sizes = [8, 8], strides = [1, 1]} : vector<16x32xf32> to vector<8x8xf32>
    %cst_16 = arith.constant dense<0.000000e+00> : vector<8x8xf32>
    %46 = tpu.matmul %44, %45, %cst_16 {dimension_numbers = #tpu.dot_dimension_numbers<[1], [1], [0], [0], [0, 0, 1, 0], [], []>} : vector<8x8xf32>, vector<8x8xf32>, vector<8x8xf32> -> vector<8x8xf32>
    %47 = vector.extract_strided_slice %41 {offsets = [0, 8], sizes = [8, 8], strides = [1, 1]} : vector<16x32xf32> to vector<8x8xf32>
    %48 = vector.extract_strided_slice %42 {offsets = [0, 8], sizes = [8, 8], strides = [1, 1]} : vector<16x32xf32> to vector<8x8xf32>
    %cst_17 = arith.constant dense<0.000000e+00> : vector<8x8xf32>
    %49 = tpu.matmul %47, %48, %cst_17 {dimension_numbers = #tpu.dot_dimension_numbers<[1], [1], [0], [0], [0, 0, 1, 0], [], []>} : vector<8x8xf32>, vector<8x8xf32>, vector<8x8xf32> -> vector<8x8xf32>
    %50 = vector.extract_strided_slice %41 {offsets = [0, 16], sizes = [8, 8], strides = [1, 1]} : vector<16x32xf32> to vector<8x8xf32>
    %51 = vector.extract_strided_slice %42 {offsets = [0, 16], sizes = [8, 8], strides = [1, 1]} : vector<16x32xf32> to vector<8x8xf32>
    %cst_18 = arith.constant dense<0.000000e+00> : vector<8x8xf32>
    %52 = tpu.matmul %50, %51, %cst_18 {dimension_numbers = #tpu.dot_dimension_numbers<[1], [1], [0], [0], [0, 0, 1, 0], [], []>} : vector<8x8xf32>, vector<8x8xf32>, vector<8x8xf32> -> vector<8x8xf32>
    %53 = vector.extract_strided_slice %41 {offsets = [0, 24], sizes = [8, 8], strides = [1, 1]} : vector<16x32xf32> to vector<8x8xf32>
    %54 = vector.extract_strided_slice %42 {offsets = [0, 24], sizes = [8, 8], strides = [1, 1]} : vector<16x32xf32> to vector<8x8xf32>
    %cst_19 = arith.constant dense<0.000000e+00> : vector<8x8xf32>
    %55 = tpu.matmul %53, %54, %cst_19 {dimension_numbers = #tpu.dot_dimension_numbers<[1], [1], [0], [0], [0, 0, 1, 0], [], []>} : vector<8x8xf32>, vector<8x8xf32>, vector<8x8xf32> -> vector<8x8xf32>
    %56 = tpu.concatenate %46, %49, %52, %55 in 0 : vector<8x8xf32>, vector<8x8xf32>, vector<8x8xf32>, vector<8x8xf32> -> vector<32x8xf32>
    %57 = vector.extract_strided_slice %41 {offsets = [8, 0], sizes = [8, 8], strides = [1, 1]} : vector<16x32xf32> to vector<8x8xf32>
    %58 = vector.extract_strided_slice %42 {offsets = [8, 0], sizes = [8, 8], strides = [1, 1]} : vector<16x32xf32> to vector<8x8xf32>
    %cst_20 = arith.constant dense<0.000000e+00> : vector<8x8xf32>
    %59 = tpu.matmul %57, %58, %cst_20 {dimension_numbers = #tpu.dot_dimension_numbers<[1], [1], [0], [0], [0, 0, 1, 0], [], []>} : vector<8x8xf32>, vector<8x8xf32>, vector<8x8xf32> -> vector<8x8xf32>
    %60 = vector.extract_strided_slice %41 {offsets = [8, 8], sizes = [8, 8], strides = [1, 1]} : vector<16x32xf32> to vector<8x8xf32>
    %61 = vector.extract_strided_slice %42 {offsets = [8, 8], sizes = [8, 8], strides = [1, 1]} : vector<16x32xf32> to vector<8x8xf32>
    %cst_21 = arith.constant dense<0.000000e+00> : vector<8x8xf32>
    %62 = tpu.matmul %60, %61, %cst_21 {dimension_numbers = #tpu.dot_dimension_numbers<[1], [1], [0], [0], [0, 0, 1, 0], [], []>} : vector<8x8xf32>, vector<8x8xf32>, vector<8x8xf32> -> vector<8x8xf32>
    %63 = vector.extract_strided_slice %41 {offsets = [8, 16], sizes = [8, 8], strides = [1, 1]} : vector<16x32xf32> to vector<8x8xf32>
    %64 = vector.extract_strided_slice %42 {offsets = [8, 16], sizes = [8, 8], strides = [1, 1]} : vector<16x32xf32> to vector<8x8xf32>
    %cst_22 = arith.constant dense<0.000000e+00> : vector<8x8xf32>
    %65 = tpu.matmul %63, %64, %cst_22 {dimension_numbers = #tpu.dot_dimension_numbers<[1], [1], [0], [0], [0, 0, 1, 0], [], []>} : vector<8x8xf32>, vector<8x8xf32>, vector<8x8xf32> -> vector<8x8xf32>
    %66 = vector.extract_strided_slice %41 {offsets = [8, 24], sizes = [8, 8], strides = [1, 1]} : vector<16x32xf32> to vector<8x8xf32>
    %67 = vector.extract_strided_slice %42 {offsets = [8, 24], sizes = [8, 8], strides = [1, 1]} : vector<16x32xf32> to vector<8x8xf32>
    %cst_23 = arith.constant dense<0.000000e+00> : vector<8x8xf32>
    %68 = tpu.matmul %66, %67, %cst_23 {dimension_numbers = #tpu.dot_dimension_numbers<[1], [1], [0], [0], [0, 0, 1, 0], [], []>} : vector<8x8xf32>, vector<8x8xf32>, vector<8x8xf32> -> vector<8x8xf32>
    %69 = tpu.concatenate %59, %62, %65, %68 in 0 : vector<8x8xf32>, vector<8x8xf32>, vector<8x8xf32>, vector<8x8xf32> -> vector<32x8xf32>
    %70 = tpu.concatenate %56, %69 in 0 : vector<32x8xf32>, vector<32x8xf32> -> vector<64x8xf32>
    %71 = arith.addf %70, %34 : vector<64x8xf32>
    %cst_24 = arith.constant dense<0xFF800000> : vector<64xf32>
    %72 = vector.multi_reduction <maximumf>, %71, %cst_24 [1] : vector<64x8xf32> to vector<64xf32>
    %73 = vector.shape_cast %72 : vector<64xf32> to vector<64x1xf32>
    %74 = vector.broadcast %73 : vector<64x1xf32> to vector<64x8xf32>
    %75 = arith.subf %71, %74 : vector<64x8xf32>
    %76 = math.exp %75 : vector<64x8xf32>
    %cst_25 = arith.constant dense<0.000000e+00> : vector<64xf32>
    %77 = vector.multi_reduction <add>, %76, %cst_25 [1] : vector<64x8xf32> to vector<64xf32>
    %78 = vector.shape_cast %77 : vector<64xf32> to vector<64x1xf32>
    %79 = tpu.reciprocal %78 {approx = true} : vector<64x1xf32> -> vector<64x1xf32>
    %80 = vector.broadcast %79 : vector<64x1xf32> to vector<64x8xf32>
    %81 = arith.mulf %76, %80 : vector<64x8xf32>
    %82 = vector.extract_strided_slice %81 {offsets = [0, 0], sizes = [8, 8], strides = [1, 1]} : vector<64x8xf32> to vector<8x8xf32>
    %83 = vector.extract_strided_slice %43 {offsets = [0, 0], sizes = [8, 8], strides = [1, 1]} : vector<16x32xf32> to vector<8x8xf32>
    %cst_26 = arith.constant dense<0.000000e+00> : vector<8x8xf32>
    %84 = tpu.matmul %82, %83, %cst_26 {dimension_numbers = #tpu.dot_dimension_numbers<[1], [0], [0], [1], [0, 0, 1, 1], [], []>} : vector<8x8xf32>, vector<8x8xf32>, vector<8x8xf32> -> vector<8x8xf32>
    %85 = vector.extract_strided_slice %81 {offsets = [8, 0], sizes = [8, 8], strides = [1, 1]} : vector<64x8xf32> to vector<8x8xf32>
    %86 = vector.extract_strided_slice %43 {offsets = [0, 8], sizes = [8, 8], strides = [1, 1]} : vector<16x32xf32> to vector<8x8xf32>
    %cst_27 = arith.constant dense<0.000000e+00> : vector<8x8xf32>
    %87 = tpu.matmul %85, %86, %cst_27 {dimension_numbers = #tpu.dot_dimension_numbers<[1], [0], [0], [1], [0, 0, 1, 1], [], []>} : vector<8x8xf32>, vector<8x8xf32>, vector<8x8xf32> -> vector<8x8xf32>
    %88 = vector.extract_strided_slice %81 {offsets = [16, 0], sizes = [8, 8], strides = [1, 1]} : vector<64x8xf32> to vector<8x8xf32>
    %89 = vector.extract_strided_slice %43 {offsets = [0, 16], sizes = [8, 8], strides = [1, 1]} : vector<16x32xf32> to vector<8x8xf32>
    %cst_28 = arith.constant dense<0.000000e+00> : vector<8x8xf32>
    %90 = tpu.matmul %88, %89, %cst_28 {dimension_numbers = #tpu.dot_dimension_numbers<[1], [0], [0], [1], [0, 0, 1, 1], [], []>} : vector<8x8xf32>, vector<8x8xf32>, vector<8x8xf32> -> vector<8x8xf32>
    %91 = vector.extract_strided_slice %81 {offsets = [24, 0], sizes = [8, 8], strides = [1, 1]} : vector<64x8xf32> to vector<8x8xf32>
    %92 = vector.extract_strided_slice %43 {offsets = [0, 24], sizes = [8, 8], strides = [1, 1]} : vector<16x32xf32> to vector<8x8xf32>
    %cst_29 = arith.constant dense<0.000000e+00> : vector<8x8xf32>
    %93 = tpu.matmul %91, %92, %cst_29 {dimension_numbers = #tpu.dot_dimension_numbers<[1], [0], [0], [1], [0, 0, 1, 1], [], []>} : vector<8x8xf32>, vector<8x8xf32>, vector<8x8xf32> -> vector<8x8xf32>
    %94 = tpu.concatenate %84, %87, %90, %93 in 1 : vector<8x8xf32>, vector<8x8xf32>, vector<8x8xf32>, vector<8x8xf32> -> vector<8x32xf32>
    %95 = vector.extract_strided_slice %81 {offsets = [32, 0], sizes = [8, 8], strides = [1, 1]} : vector<64x8xf32> to vector<8x8xf32>
    %96 = vector.extract_strided_slice %43 {offsets = [8, 0], sizes = [8, 8], strides = [1, 1]} : vector<16x32xf32> to vector<8x8xf32>
    %cst_30 = arith.constant dense<0.000000e+00> : vector<8x8xf32>
    %97 = tpu.matmul %95, %96, %cst_30 {dimension_numbers = #tpu.dot_dimension_numbers<[1], [0], [0], [1], [0, 0, 1, 1], [], []>} : vector<8x8xf32>, vector<8x8xf32>, vector<8x8xf32> -> vector<8x8xf32>
    %98 = vector.extract_strided_slice %81 {offsets = [40, 0], sizes = [8, 8], strides = [1, 1]} : vector<64x8xf32> to vector<8x8xf32>
    %99 = vector.extract_strided_slice %43 {offsets = [8, 8], sizes = [8, 8], strides = [1, 1]} : vector<16x32xf32> to vector<8x8xf32>
    %cst_31 = arith.constant dense<0.000000e+00> : vector<8x8xf32>
    %100 = tpu.matmul %98, %99, %cst_31 {dimension_numbers = #tpu.dot_dimension_numbers<[1], [0], [0], [1], [0, 0, 1, 1], [], []>} : vector<8x8xf32>, vector<8x8xf32>, vector<8x8xf32> -> vector<8x8xf32>
    %101 = vector.extract_strided_slice %81 {offsets = [48, 0], sizes = [8, 8], strides = [1, 1]} : vector<64x8xf32> to vector<8x8xf32>
    %102 = vector.extract_strided_slice %43 {offsets = [8, 16], sizes = [8, 8], strides = [1, 1]} : vector<16x32xf32> to vector<8x8xf32>
    %cst_32 = arith.constant dense<0.000000e+00> : vector<8x8xf32>
    %103 = tpu.matmul %101, %102, %cst_32 {dimension_numbers = #tpu.dot_dimension_numbers<[1], [0], [0], [1], [0, 0, 1, 1], [], []>} : vector<8x8xf32>, vector<8x8xf32>, vector<8x8xf32> -> vector<8x8xf32>
    %104 = vector.extract_strided_slice %81 {offsets = [56, 0], sizes = [8, 8], strides = [1, 1]} : vector<64x8xf32> to vector<8x8xf32>
    %105 = vector.extract_strided_slice %43 {offsets = [8, 24], sizes = [8, 8], strides = [1, 1]} : vector<16x32xf32> to vector<8x8xf32>
    %cst_33 = arith.constant dense<0.000000e+00> : vector<8x8xf32>
    %106 = tpu.matmul %104, %105, %cst_33 {dimension_numbers = #tpu.dot_dimension_numbers<[1], [0], [0], [1], [0, 0, 1, 1], [], []>} : vector<8x8xf32>, vector<8x8xf32>, vector<8x8xf32> -> vector<8x8xf32>
    %107 = tpu.concatenate %97, %100, %103, %106 in 1 : vector<8x8xf32>, vector<8x8xf32>, vector<8x8xf32>, vector<8x8xf32> -> vector<8x32xf32>
    %108 = tpu.concatenate %94, %107 in 0 : vector<8x32xf32>, vector<8x32xf32> -> vector<16x32xf32>
    %c32 = arith.constant 32 : index
    %c0_34 = arith.constant 0 : index
    %109 = vector.load %arg2[%c32, %c0_34] : memref<384x128xf32, #tpu.memory_space<vmem>>, vector<32x128xf32>
    %cst_35 = arith.constant dense<0.000000e+00> : vector<16x128xf32>
    %110 = tpu.matmul %108, %109, %cst_35 {dimension_numbers = #tpu.dot_dimension_numbers<[1], [0], [0], [1], [0, 0, 1, 1], [], []>} : vector<16x32xf32>, vector<32x128xf32>, vector<16x128xf32> -> vector<16x128xf32>
    %111 = vector.extract_strided_slice %110 {offsets = [0, 0], sizes = [16, 32], strides = [1, 1]} : vector<16x128xf32> to vector<16x32xf32>
    %c3 = arith.constant 3 : index
    %c0_36 = arith.constant 0 : index
    %112 = vector.load %arg3[%c3, %c0_36] : memref<20x128xf32, #tpu.memory_space<vmem>>, vector<1x32xf32>
    %113 = vector.broadcast %112 : vector<1x32xf32> to vector<16x32xf32>
    %114 = arith.addf %111, %113 : vector<16x32xf32>
    %115 = arith.addf %22, %114 : vector<16x32xf32>
    %c4 = arith.constant 4 : index
    %c0_37 = arith.constant 0 : index
    %116 = vector.load %arg3[%c4, %c0_37] : memref<20x128xf32, #tpu.memory_space<vmem>>, vector<1x32xf32>
    %c5 = arith.constant 5 : index
    %c0_38 = arith.constant 0 : index
    %117 = vector.load %arg3[%c5, %c0_38] : memref<20x128xf32, #tpu.memory_space<vmem>>, vector<1x32xf32>
    %cst_39 = arith.constant dense<0.000000e+00> : vector<16xf32>
    %118 = vector.multi_reduction <add>, %115, %cst_39 [1] : vector<16x32xf32> to vector<16xf32>
    %119 = vector.shape_cast %118 : vector<16xf32> to vector<16x1xf32>
    %cst_40 = arith.constant 3.200000e+01 : f32
    %120 = vector.broadcast %cst_40 : f32 to vector<16x1xf32>
    %121 = arith.divf %119, %120 : vector<16x1xf32>
    %122 = vector.broadcast %121 : vector<16x1xf32> to vector<16x32xf32>
    %123 = arith.subf %115, %122 : vector<16x32xf32>
    %124 = arith.mulf %123, %123 : vector<16x32xf32>
    %cst_41 = arith.constant dense<0.000000e+00> : vector<16xf32>
    %125 = vector.multi_reduction <add>, %124, %cst_41 [1] : vector<16x32xf32> to vector<16xf32>
    %126 = vector.shape_cast %125 : vector<16xf32> to vector<16x1xf32>
    %cst_42 = arith.constant 3.200000e+01 : f32
    %127 = vector.broadcast %cst_42 : f32 to vector<16x1xf32>
    %128 = arith.divf %126, %127 : vector<16x1xf32>
    %cst_43 = arith.constant 9.99999996E-13 : f32
    %129 = vector.broadcast %cst_43 : f32 to vector<16x1xf32>
    %130 = arith.addf %128, %129 : vector<16x1xf32>
    %131 = math.rsqrt %130 : vector<16x1xf32>
    %132 = vector.broadcast %131 : vector<16x1xf32> to vector<16x32xf32>
    %133 = arith.mulf %123, %132 : vector<16x32xf32>
    %134 = vector.broadcast %116 : vector<1x32xf32> to vector<16x32xf32>
    %135 = arith.mulf %133, %134 : vector<16x32xf32>
    %136 = vector.broadcast %117 : vector<1x32xf32> to vector<16x32xf32>
    %137 = arith.addf %135, %136 : vector<16x32xf32>
    %c64 = arith.constant 64 : index
    %c0_44 = arith.constant 0 : index
    %138 = vector.load %arg2[%c64, %c0_44] : memref<384x128xf32, #tpu.memory_space<vmem>>, vector<32x128xf32>
    %cst_45 = arith.constant dense<0.000000e+00> : vector<16x128xf32>
    %139 = tpu.matmul %137, %138, %cst_45 {dimension_numbers = #tpu.dot_dimension_numbers<[1], [0], [0], [1], [0, 0, 1, 1], [], []>} : vector<16x32xf32>, vector<32x128xf32>, vector<16x128xf32> -> vector<16x128xf32>
    %140 = vector.extract_strided_slice %139 {offsets = [0, 0], sizes = [16, 64], strides = [1, 1]} : vector<16x128xf32> to vector<16x64xf32>
    %c6 = arith.constant 6 : index
    %c0_46 = arith.constant 0 : index
    %141 = vector.load %arg3[%c6, %c0_46] : memref<20x128xf32, #tpu.memory_space<vmem>>, vector<1x64xf32>
    %142 = vector.broadcast %141 : vector<1x64xf32> to vector<16x64xf32>
    %143 = arith.addf %140, %142 : vector<16x64xf32>
    %144 = arith.mulf %143, %143 : vector<16x64xf32>
    %145 = arith.mulf %143, %144 : vector<16x64xf32>
    %cst_47 = arith.constant 4.471500e-02 : f32
    %146 = vector.broadcast %cst_47 : f32 to vector<16x64xf32>
    %147 = arith.mulf %146, %145 : vector<16x64xf32>
    %148 = arith.addf %143, %147 : vector<16x64xf32>
    %cst_48 = arith.constant 0.797884583 : f32
    %149 = vector.broadcast %cst_48 : f32 to vector<16x64xf32>
    %150 = arith.mulf %149, %148 : vector<16x64xf32>
    %151 = math.tanh %150 : vector<16x64xf32>
    %cst_49 = arith.constant 1.000000e+00 : f32
    %152 = vector.broadcast %cst_49 : f32 to vector<16x64xf32>
    %153 = arith.addf %152, %151 : vector<16x64xf32>
    %cst_50 = arith.constant 5.000000e-01 : f32
    %154 = vector.broadcast %cst_50 : f32 to vector<16x64xf32>
    %155 = arith.mulf %154, %153 : vector<16x64xf32>
    %156 = arith.mulf %143, %155 : vector<16x64xf32>
    %c96 = arith.constant 96 : index
    %c0_51 = arith.constant 0 : index
    %157 = vector.load %arg2[%c96, %c0_51] : memref<384x128xf32, #tpu.memory_space<vmem>>, vector<64x128xf32>
    %cst_52 = arith.constant dense<0.000000e+00> : vector<16x128xf32>
    %158 = tpu.matmul %156, %157, %cst_52 {dimension_numbers = #tpu.dot_dimension_numbers<[1], [0], [0], [1], [0, 0, 1, 1], [], []>} : vector<16x64xf32>, vector<64x128xf32>, vector<16x128xf32> -> vector<16x128xf32>
    %159 = vector.extract_strided_slice %158 {offsets = [0, 0], sizes = [16, 32], strides = [1, 1]} : vector<16x128xf32> to vector<16x32xf32>
    %c7 = arith.constant 7 : index
    %c0_53 = arith.constant 0 : index
    %160 = vector.load %arg3[%c7, %c0_53] : memref<20x128xf32, #tpu.memory_space<vmem>>, vector<1x32xf32>
    %161 = vector.broadcast %160 : vector<1x32xf32> to vector<16x32xf32>
    %162 = arith.addf %159, %161 : vector<16x32xf32>
    %163 = arith.addf %137, %162 : vector<16x32xf32>
    %c8 = arith.constant 8 : index
    %c0_54 = arith.constant 0 : index
    %164 = vector.load %arg3[%c8, %c0_54] : memref<20x128xf32, #tpu.memory_space<vmem>>, vector<1x32xf32>
    %c9 = arith.constant 9 : index
    %c0_55 = arith.constant 0 : index
    %165 = vector.load %arg3[%c9, %c0_55] : memref<20x128xf32, #tpu.memory_space<vmem>>, vector<1x32xf32>
    %cst_56 = arith.constant dense<0.000000e+00> : vector<16xf32>
    %166 = vector.multi_reduction <add>, %163, %cst_56 [1] : vector<16x32xf32> to vector<16xf32>
    %167 = vector.shape_cast %166 : vector<16xf32> to vector<16x1xf32>
    %cst_57 = arith.constant 3.200000e+01 : f32
    %168 = vector.broadcast %cst_57 : f32 to vector<16x1xf32>
    %169 = arith.divf %167, %168 : vector<16x1xf32>
    %170 = vector.broadcast %169 : vector<16x1xf32> to vector<16x32xf32>
    %171 = arith.subf %163, %170 : vector<16x32xf32>
    %172 = arith.mulf %171, %171 : vector<16x32xf32>
    %cst_58 = arith.constant dense<0.000000e+00> : vector<16xf32>
    %173 = vector.multi_reduction <add>, %172, %cst_58 [1] : vector<16x32xf32> to vector<16xf32>
    %174 = vector.shape_cast %173 : vector<16xf32> to vector<16x1xf32>
    %cst_59 = arith.constant 3.200000e+01 : f32
    %175 = vector.broadcast %cst_59 : f32 to vector<16x1xf32>
    %176 = arith.divf %174, %175 : vector<16x1xf32>
    %cst_60 = arith.constant 9.99999996E-13 : f32
    %177 = vector.broadcast %cst_60 : f32 to vector<16x1xf32>
    %178 = arith.addf %176, %177 : vector<16x1xf32>
    %179 = math.rsqrt %178 : vector<16x1xf32>
    %180 = vector.broadcast %179 : vector<16x1xf32> to vector<16x32xf32>
    %181 = arith.mulf %171, %180 : vector<16x32xf32>
    %182 = vector.broadcast %164 : vector<1x32xf32> to vector<16x32xf32>
    %183 = arith.mulf %181, %182 : vector<16x32xf32>
    %184 = vector.broadcast %165 : vector<1x32xf32> to vector<16x32xf32>
    %185 = arith.addf %183, %184 : vector<16x32xf32>
    %c160 = arith.constant 160 : index
    %c0_61 = arith.constant 0 : index
    %186 = vector.load %arg2[%c160, %c0_61] : memref<384x128xf32, #tpu.memory_space<vmem>>, vector<32x128xf32>
    %cst_62 = arith.constant dense<0.000000e+00> : vector<16x128xf32>
    %187 = tpu.matmul %185, %186, %cst_62 {dimension_numbers = #tpu.dot_dimension_numbers<[1], [0], [0], [1], [0, 0, 1, 1], [], []>} : vector<16x32xf32>, vector<32x128xf32>, vector<16x128xf32> -> vector<16x128xf32>
    %188 = vector.extract_strided_slice %187 {offsets = [0, 0], sizes = [16, 96], strides = [1, 1]} : vector<16x128xf32> to vector<16x96xf32>
    %c10 = arith.constant 10 : index
    %c0_63 = arith.constant 0 : index
    %189 = vector.load %arg3[%c10, %c0_63] : memref<20x128xf32, #tpu.memory_space<vmem>>, vector<1x96xf32>
    %190 = vector.broadcast %189 : vector<1x96xf32> to vector<16x96xf32>
    %191 = arith.addf %188, %190 : vector<16x96xf32>
    %192 = vector.extract_strided_slice %191 {offsets = [0, 0], sizes = [16, 32], strides = [1, 1]} : vector<16x96xf32> to vector<16x32xf32>
    %193 = vector.extract_strided_slice %191 {offsets = [0, 32], sizes = [16, 32], strides = [1, 1]} : vector<16x96xf32> to vector<16x32xf32>
    %194 = vector.extract_strided_slice %191 {offsets = [0, 64], sizes = [16, 32], strides = [1, 1]} : vector<16x96xf32> to vector<16x32xf32>
    %195 = vector.extract_strided_slice %192 {offsets = [0, 0], sizes = [8, 8], strides = [1, 1]} : vector<16x32xf32> to vector<8x8xf32>
    %196 = vector.extract_strided_slice %193 {offsets = [0, 0], sizes = [8, 8], strides = [1, 1]} : vector<16x32xf32> to vector<8x8xf32>
    %cst_64 = arith.constant dense<0.000000e+00> : vector<8x8xf32>
    %197 = tpu.matmul %195, %196, %cst_64 {dimension_numbers = #tpu.dot_dimension_numbers<[1], [1], [0], [0], [0, 0, 1, 0], [], []>} : vector<8x8xf32>, vector<8x8xf32>, vector<8x8xf32> -> vector<8x8xf32>
    %198 = vector.extract_strided_slice %192 {offsets = [0, 8], sizes = [8, 8], strides = [1, 1]} : vector<16x32xf32> to vector<8x8xf32>
    %199 = vector.extract_strided_slice %193 {offsets = [0, 8], sizes = [8, 8], strides = [1, 1]} : vector<16x32xf32> to vector<8x8xf32>
    %cst_65 = arith.constant dense<0.000000e+00> : vector<8x8xf32>
    %200 = tpu.matmul %198, %199, %cst_65 {dimension_numbers = #tpu.dot_dimension_numbers<[1], [1], [0], [0], [0, 0, 1, 0], [], []>} : vector<8x8xf32>, vector<8x8xf32>, vector<8x8xf32> -> vector<8x8xf32>
    %201 = vector.extract_strided_slice %192 {offsets = [0, 16], sizes = [8, 8], strides = [1, 1]} : vector<16x32xf32> to vector<8x8xf32>
    %202 = vector.extract_strided_slice %193 {offsets = [0, 16], sizes = [8, 8], strides = [1, 1]} : vector<16x32xf32> to vector<8x8xf32>
    %cst_66 = arith.constant dense<0.000000e+00> : vector<8x8xf32>
    %203 = tpu.matmul %201, %202, %cst_66 {dimension_numbers = #tpu.dot_dimension_numbers<[1], [1], [0], [0], [0, 0, 1, 0], [], []>} : vector<8x8xf32>, vector<8x8xf32>, vector<8x8xf32> -> vector<8x8xf32>
    %204 = vector.extract_strided_slice %192 {offsets = [0, 24], sizes = [8, 8], strides = [1, 1]} : vector<16x32xf32> to vector<8x8xf32>
    %205 = vector.extract_strided_slice %193 {offsets = [0, 24], sizes = [8, 8], strides = [1, 1]} : vector<16x32xf32> to vector<8x8xf32>
    %cst_67 = arith.constant dense<0.000000e+00> : vector<8x8xf32>
    %206 = tpu.matmul %204, %205, %cst_67 {dimension_numbers = #tpu.dot_dimension_numbers<[1], [1], [0], [0], [0, 0, 1, 0], [], []>} : vector<8x8xf32>, vector<8x8xf32>, vector<8x8xf32> -> vector<8x8xf32>
    %207 = tpu.concatenate %197, %200, %203, %206 in 0 : vector<8x8xf32>, vector<8x8xf32>, vector<8x8xf32>, vector<8x8xf32> -> vector<32x8xf32>
    %208 = vector.extract_strided_slice %192 {offsets = [8, 0], sizes = [8, 8], strides = [1, 1]} : vector<16x32xf32> to vector<8x8xf32>
    %209 = vector.extract_strided_slice %193 {offsets = [8, 0], sizes = [8, 8], strides = [1, 1]} : vector<16x32xf32> to vector<8x8xf32>
    %cst_68 = arith.constant dense<0.000000e+00> : vector<8x8xf32>
    %210 = tpu.matmul %208, %209, %cst_68 {dimension_numbers = #tpu.dot_dimension_numbers<[1], [1], [0], [0], [0, 0, 1, 0], [], []>} : vector<8x8xf32>, vector<8x8xf32>, vector<8x8xf32> -> vector<8x8xf32>
    %211 = vector.extract_strided_slice %192 {offsets = [8, 8], sizes = [8, 8], strides = [1, 1]} : vector<16x32xf32> to vector<8x8xf32>
    %212 = vector.extract_strided_slice %193 {offsets = [8, 8], sizes = [8, 8], strides = [1, 1]} : vector<16x32xf32> to vector<8x8xf32>
    %cst_69 = arith.constant dense<0.000000e+00> : vector<8x8xf32>
    %213 = tpu.matmul %211, %212, %cst_69 {dimension_numbers = #tpu.dot_dimension_numbers<[1], [1], [0], [0], [0, 0, 1, 0], [], []>} : vector<8x8xf32>, vector<8x8xf32>, vector<8x8xf32> -> vector<8x8xf32>
    %214 = vector.extract_strided_slice %192 {offsets = [8, 16], sizes = [8, 8], strides = [1, 1]} : vector<16x32xf32> to vector<8x8xf32>
    %215 = vector.extract_strided_slice %193 {offsets = [8, 16], sizes = [8, 8], strides = [1, 1]} : vector<16x32xf32> to vector<8x8xf32>
    %cst_70 = arith.constant dense<0.000000e+00> : vector<8x8xf32>
    %216 = tpu.matmul %214, %215, %cst_70 {dimension_numbers = #tpu.dot_dimension_numbers<[1], [1], [0], [0], [0, 0, 1, 0], [], []>} : vector<8x8xf32>, vector<8x8xf32>, vector<8x8xf32> -> vector<8x8xf32>
    %217 = vector.extract_strided_slice %192 {offsets = [8, 24], sizes = [8, 8], strides = [1, 1]} : vector<16x32xf32> to vector<8x8xf32>
    %218 = vector.extract_strided_slice %193 {offsets = [8, 24], sizes = [8, 8], strides = [1, 1]} : vector<16x32xf32> to vector<8x8xf32>
    %cst_71 = arith.constant dense<0.000000e+00> : vector<8x8xf32>
    %219 = tpu.matmul %217, %218, %cst_71 {dimension_numbers = #tpu.dot_dimension_numbers<[1], [1], [0], [0], [0, 0, 1, 0], [], []>} : vector<8x8xf32>, vector<8x8xf32>, vector<8x8xf32> -> vector<8x8xf32>
    %220 = tpu.concatenate %210, %213, %216, %219 in 0 : vector<8x8xf32>, vector<8x8xf32>, vector<8x8xf32>, vector<8x8xf32> -> vector<32x8xf32>
    %221 = tpu.concatenate %207, %220 in 0 : vector<32x8xf32>, vector<32x8xf32> -> vector<64x8xf32>
    %222 = arith.addf %221, %34 : vector<64x8xf32>
    %cst_72 = arith.constant dense<0xFF800000> : vector<64xf32>
    %223 = vector.multi_reduction <maximumf>, %222, %cst_72 [1] : vector<64x8xf32> to vector<64xf32>
    %224 = vector.shape_cast %223 : vector<64xf32> to vector<64x1xf32>
    %225 = vector.broadcast %224 : vector<64x1xf32> to vector<64x8xf32>
    %226 = arith.subf %222, %225 : vector<64x8xf32>
    %227 = math.exp %226 : vector<64x8xf32>
    %cst_73 = arith.constant dense<0.000000e+00> : vector<64xf32>
    %228 = vector.multi_reduction <add>, %227, %cst_73 [1] : vector<64x8xf32> to vector<64xf32>
    %229 = vector.shape_cast %228 : vector<64xf32> to vector<64x1xf32>
    %230 = tpu.reciprocal %229 {approx = true} : vector<64x1xf32> -> vector<64x1xf32>
    %231 = vector.broadcast %230 : vector<64x1xf32> to vector<64x8xf32>
    %232 = arith.mulf %227, %231 : vector<64x8xf32>
    %233 = vector.extract_strided_slice %232 {offsets = [0, 0], sizes = [8, 8], strides = [1, 1]} : vector<64x8xf32> to vector<8x8xf32>
    %234 = vector.extract_strided_slice %194 {offsets = [0, 0], sizes = [8, 8], strides = [1, 1]} : vector<16x32xf32> to vector<8x8xf32>
    %cst_74 = arith.constant dense<0.000000e+00> : vector<8x8xf32>
    %235 = tpu.matmul %233, %234, %cst_74 {dimension_numbers = #tpu.dot_dimension_numbers<[1], [0], [0], [1], [0, 0, 1, 1], [], []>} : vector<8x8xf32>, vector<8x8xf32>, vector<8x8xf32> -> vector<8x8xf32>
    %236 = vector.extract_strided_slice %232 {offsets = [8, 0], sizes = [8, 8], strides = [1, 1]} : vector<64x8xf32> to vector<8x8xf32>
    %237 = vector.extract_strided_slice %194 {offsets = [0, 8], sizes = [8, 8], strides = [1, 1]} : vector<16x32xf32> to vector<8x8xf32>
    %cst_75 = arith.constant dense<0.000000e+00> : vector<8x8xf32>
    %238 = tpu.matmul %236, %237, %cst_75 {dimension_numbers = #tpu.dot_dimension_numbers<[1], [0], [0], [1], [0, 0, 1, 1], [], []>} : vector<8x8xf32>, vector<8x8xf32>, vector<8x8xf32> -> vector<8x8xf32>
    %239 = vector.extract_strided_slice %232 {offsets = [16, 0], sizes = [8, 8], strides = [1, 1]} : vector<64x8xf32> to vector<8x8xf32>
    %240 = vector.extract_strided_slice %194 {offsets = [0, 16], sizes = [8, 8], strides = [1, 1]} : vector<16x32xf32> to vector<8x8xf32>
    %cst_76 = arith.constant dense<0.000000e+00> : vector<8x8xf32>
    %241 = tpu.matmul %239, %240, %cst_76 {dimension_numbers = #tpu.dot_dimension_numbers<[1], [0], [0], [1], [0, 0, 1, 1], [], []>} : vector<8x8xf32>, vector<8x8xf32>, vector<8x8xf32> -> vector<8x8xf32>
    %242 = vector.extract_strided_slice %232 {offsets = [24, 0], sizes = [8, 8], strides = [1, 1]} : vector<64x8xf32> to vector<8x8xf32>
    %243 = vector.extract_strided_slice %194 {offsets = [0, 24], sizes = [8, 8], strides = [1, 1]} : vector<16x32xf32> to vector<8x8xf32>
    %cst_77 = arith.constant dense<0.000000e+00> : vector<8x8xf32>
    %244 = tpu.matmul %242, %243, %cst_77 {dimension_numbers = #tpu.dot_dimension_numbers<[1], [0], [0], [1], [0, 0, 1, 1], [], []>} : vector<8x8xf32>, vector<8x8xf32>, vector<8x8xf32> -> vector<8x8xf32>
    %245 = tpu.concatenate %235, %238, %241, %244 in 1 : vector<8x8xf32>, vector<8x8xf32>, vector<8x8xf32>, vector<8x8xf32> -> vector<8x32xf32>
    %246 = vector.extract_strided_slice %232 {offsets = [32, 0], sizes = [8, 8], strides = [1, 1]} : vector<64x8xf32> to vector<8x8xf32>
    %247 = vector.extract_strided_slice %194 {offsets = [8, 0], sizes = [8, 8], strides = [1, 1]} : vector<16x32xf32> to vector<8x8xf32>
    %cst_78 = arith.constant dense<0.000000e+00> : vector<8x8xf32>
    %248 = tpu.matmul %246, %247, %cst_78 {dimension_numbers = #tpu.dot_dimension_numbers<[1], [0], [0], [1], [0, 0, 1, 1], [], []>} : vector<8x8xf32>, vector<8x8xf32>, vector<8x8xf32> -> vector<8x8xf32>
    %249 = vector.extract_strided_slice %232 {offsets = [40, 0], sizes = [8, 8], strides = [1, 1]} : vector<64x8xf32> to vector<8x8xf32>
    %250 = vector.extract_strided_slice %194 {offsets = [8, 8], sizes = [8, 8], strides = [1, 1]} : vector<16x32xf32> to vector<8x8xf32>
    %cst_79 = arith.constant dense<0.000000e+00> : vector<8x8xf32>
    %251 = tpu.matmul %249, %250, %cst_79 {dimension_numbers = #tpu.dot_dimension_numbers<[1], [0], [0], [1], [0, 0, 1, 1], [], []>} : vector<8x8xf32>, vector<8x8xf32>, vector<8x8xf32> -> vector<8x8xf32>
    %252 = vector.extract_strided_slice %232 {offsets = [48, 0], sizes = [8, 8], strides = [1, 1]} : vector<64x8xf32> to vector<8x8xf32>
    %253 = vector.extract_strided_slice %194 {offsets = [8, 16], sizes = [8, 8], strides = [1, 1]} : vector<16x32xf32> to vector<8x8xf32>
    %cst_80 = arith.constant dense<0.000000e+00> : vector<8x8xf32>
    %254 = tpu.matmul %252, %253, %cst_80 {dimension_numbers = #tpu.dot_dimension_numbers<[1], [0], [0], [1], [0, 0, 1, 1], [], []>} : vector<8x8xf32>, vector<8x8xf32>, vector<8x8xf32> -> vector<8x8xf32>
    %255 = vector.extract_strided_slice %232 {offsets = [56, 0], sizes = [8, 8], strides = [1, 1]} : vector<64x8xf32> to vector<8x8xf32>
    %256 = vector.extract_strided_slice %194 {offsets = [8, 24], sizes = [8, 8], strides = [1, 1]} : vector<16x32xf32> to vector<8x8xf32>
    %cst_81 = arith.constant dense<0.000000e+00> : vector<8x8xf32>
    %257 = tpu.matmul %255, %256, %cst_81 {dimension_numbers = #tpu.dot_dimension_numbers<[1], [0], [0], [1], [0, 0, 1, 1], [], []>} : vector<8x8xf32>, vector<8x8xf32>, vector<8x8xf32> -> vector<8x8xf32>
    %258 = tpu.concatenate %248, %251, %254, %257 in 1 : vector<8x8xf32>, vector<8x8xf32>, vector<8x8xf32>, vector<8x8xf32> -> vector<8x32xf32>
    %259 = tpu.concatenate %245, %258 in 0 : vector<8x32xf32>, vector<8x32xf32> -> vector<16x32xf32>
    %c192 = arith.constant 192 : index
    %c0_82 = arith.constant 0 : index
    %260 = vector.load %arg2[%c192, %c0_82] : memref<384x128xf32, #tpu.memory_space<vmem>>, vector<32x128xf32>
    %cst_83 = arith.constant dense<0.000000e+00> : vector<16x128xf32>
    %261 = tpu.matmul %259, %260, %cst_83 {dimension_numbers = #tpu.dot_dimension_numbers<[1], [0], [0], [1], [0, 0, 1, 1], [], []>} : vector<16x32xf32>, vector<32x128xf32>, vector<16x128xf32> -> vector<16x128xf32>
    %262 = vector.extract_strided_slice %261 {offsets = [0, 0], sizes = [16, 32], strides = [1, 1]} : vector<16x128xf32> to vector<16x32xf32>
    %c11 = arith.constant 11 : index
    %c0_84 = arith.constant 0 : index
    %263 = vector.load %arg3[%c11, %c0_84] : memref<20x128xf32, #tpu.memory_space<vmem>>, vector<1x32xf32>
    %264 = vector.broadcast %263 : vector<1x32xf32> to vector<16x32xf32>
    %265 = arith.addf %262, %264 : vector<16x32xf32>
    %266 = arith.addf %185, %265 : vector<16x32xf32>
    %c12 = arith.constant 12 : index
    %c0_85 = arith.constant 0 : index
    %267 = vector.load %arg3[%c12, %c0_85] : memref<20x128xf32, #tpu.memory_space<vmem>>, vector<1x32xf32>
    %c13 = arith.constant 13 : index
    %c0_86 = arith.constant 0 : index
    %268 = vector.load %arg3[%c13, %c0_86] : memref<20x128xf32, #tpu.memory_space<vmem>>, vector<1x32xf32>
    %cst_87 = arith.constant dense<0.000000e+00> : vector<16xf32>
    %269 = vector.multi_reduction <add>, %266, %cst_87 [1] : vector<16x32xf32> to vector<16xf32>
    %270 = vector.shape_cast %269 : vector<16xf32> to vector<16x1xf32>
    %cst_88 = arith.constant 3.200000e+01 : f32
    %271 = vector.broadcast %cst_88 : f32 to vector<16x1xf32>
    %272 = arith.divf %270, %271 : vector<16x1xf32>
    %273 = vector.broadcast %272 : vector<16x1xf32> to vector<16x32xf32>
    %274 = arith.subf %266, %273 : vector<16x32xf32>
    %275 = arith.mulf %274, %274 : vector<16x32xf32>
    %cst_89 = arith.constant dense<0.000000e+00> : vector<16xf32>
    %276 = vector.multi_reduction <add>, %275, %cst_89 [1] : vector<16x32xf32> to vector<16xf32>
    %277 = vector.shape_cast %276 : vector<16xf32> to vector<16x1xf32>
    %cst_90 = arith.constant 3.200000e+01 : f32
    %278 = vector.broadcast %cst_90 : f32 to vector<16x1xf32>
    %279 = arith.divf %277, %278 : vector<16x1xf32>
    %cst_91 = arith.constant 9.99999996E-13 : f32
    %280 = vector.broadcast %cst_91 : f32 to vector<16x1xf32>
    %281 = arith.addf %279, %280 : vector<16x1xf32>
    %282 = math.rsqrt %281 : vector<16x1xf32>
    %283 = vector.broadcast %282 : vector<16x1xf32> to vector<16x32xf32>
    %284 = arith.mulf %274, %283 : vector<16x32xf32>
    %285 = vector.broadcast %267 : vector<1x32xf32> to vector<16x32xf32>
    %286 = arith.mulf %284, %285 : vector<16x32xf32>
    %287 = vector.broadcast %268 : vector<1x32xf32> to vector<16x32xf32>
    %288 = arith.addf %286, %287 : vector<16x32xf32>
    %c224 = arith.constant 224 : index
    %c0_92 = arith.constant 0 : index
    %289 = vector.load %arg2[%c224, %c0_92] : memref<384x128xf32, #tpu.memory_space<vmem>>, vector<32x128xf32>
    %cst_93 = arith.constant dense<0.000000e+00> : vector<16x128xf32>
    %290 = tpu.matmul %288, %289, %cst_93 {dimension_numbers = #tpu.dot_dimension_numbers<[1], [0], [0], [1], [0, 0, 1, 1], [], []>} : vector<16x32xf32>, vector<32x128xf32>, vector<16x128xf32> -> vector<16x128xf32>
    %291 = vector.extract_strided_slice %290 {offsets = [0, 0], sizes = [16, 64], strides = [1, 1]} : vector<16x128xf32> to vector<16x64xf32>
    %c14 = arith.constant 14 : index
    %c0_94 = arith.constant 0 : index
    %292 = vector.load %arg3[%c14, %c0_94] : memref<20x128xf32, #tpu.memory_space<vmem>>, vector<1x64xf32>
    %293 = vector.broadcast %292 : vector<1x64xf32> to vector<16x64xf32>
    %294 = arith.addf %291, %293 : vector<16x64xf32>
    %295 = arith.mulf %294, %294 : vector<16x64xf32>
    %296 = arith.mulf %294, %295 : vector<16x64xf32>
    %cst_95 = arith.constant 4.471500e-02 : f32
    %297 = vector.broadcast %cst_95 : f32 to vector<16x64xf32>
    %298 = arith.mulf %297, %296 : vector<16x64xf32>
    %299 = arith.addf %294, %298 : vector<16x64xf32>
    %cst_96 = arith.constant 0.797884583 : f32
    %300 = vector.broadcast %cst_96 : f32 to vector<16x64xf32>
    %301 = arith.mulf %300, %299 : vector<16x64xf32>
    %302 = math.tanh %301 : vector<16x64xf32>
    %cst_97 = arith.constant 1.000000e+00 : f32
    %303 = vector.broadcast %cst_97 : f32 to vector<16x64xf32>
    %304 = arith.addf %303, %302 : vector<16x64xf32>
    %cst_98 = arith.constant 5.000000e-01 : f32
    %305 = vector.broadcast %cst_98 : f32 to vector<16x64xf32>
    %306 = arith.mulf %305, %304 : vector<16x64xf32>
    %307 = arith.mulf %294, %306 : vector<16x64xf32>
    %c256 = arith.constant 256 : index
    %c0_99 = arith.constant 0 : index
    %308 = vector.load %arg2[%c256, %c0_99] : memref<384x128xf32, #tpu.memory_space<vmem>>, vector<64x128xf32>
    %cst_100 = arith.constant dense<0.000000e+00> : vector<16x128xf32>
    %309 = tpu.matmul %307, %308, %cst_100 {dimension_numbers = #tpu.dot_dimension_numbers<[1], [0], [0], [1], [0, 0, 1, 1], [], []>} : vector<16x64xf32>, vector<64x128xf32>, vector<16x128xf32> -> vector<16x128xf32>
    %310 = vector.extract_strided_slice %309 {offsets = [0, 0], sizes = [16, 32], strides = [1, 1]} : vector<16x128xf32> to vector<16x32xf32>
    %c15 = arith.constant 15 : index
    %c0_101 = arith.constant 0 : index
    %311 = vector.load %arg3[%c15, %c0_101] : memref<20x128xf32, #tpu.memory_space<vmem>>, vector<1x32xf32>
    %312 = vector.broadcast %311 : vector<1x32xf32> to vector<16x32xf32>
    %313 = arith.addf %310, %312 : vector<16x32xf32>
    %314 = arith.addf %288, %313 : vector<16x32xf32>
    %c16 = arith.constant 16 : index
    %c0_102 = arith.constant 0 : index
    %315 = vector.load %arg3[%c16, %c0_102] : memref<20x128xf32, #tpu.memory_space<vmem>>, vector<1x32xf32>
    %c17 = arith.constant 17 : index
    %c0_103 = arith.constant 0 : index
    %316 = vector.load %arg3[%c17, %c0_103] : memref<20x128xf32, #tpu.memory_space<vmem>>, vector<1x32xf32>
    %cst_104 = arith.constant dense<0.000000e+00> : vector<16xf32>
    %317 = vector.multi_reduction <add>, %314, %cst_104 [1] : vector<16x32xf32> to vector<16xf32>
    %318 = vector.shape_cast %317 : vector<16xf32> to vector<16x1xf32>
    %cst_105 = arith.constant 3.200000e+01 : f32
    %319 = vector.broadcast %cst_105 : f32 to vector<16x1xf32>
    %320 = arith.divf %318, %319 : vector<16x1xf32>
    %321 = vector.broadcast %320 : vector<16x1xf32> to vector<16x32xf32>
    %322 = arith.subf %314, %321 : vector<16x32xf32>
    %323 = arith.mulf %322, %322 : vector<16x32xf32>
    %cst_106 = arith.constant dense<0.000000e+00> : vector<16xf32>
    %324 = vector.multi_reduction <add>, %323, %cst_106 [1] : vector<16x32xf32> to vector<16xf32>
    %325 = vector.shape_cast %324 : vector<16xf32> to vector<16x1xf32>
    %cst_107 = arith.constant 3.200000e+01 : f32
    %326 = vector.broadcast %cst_107 : f32 to vector<16x1xf32>
    %327 = arith.divf %325, %326 : vector<16x1xf32>
    %cst_108 = arith.constant 9.99999996E-13 : f32
    %328 = vector.broadcast %cst_108 : f32 to vector<16x1xf32>
    %329 = arith.addf %327, %328 : vector<16x1xf32>
    %330 = math.rsqrt %329 : vector<16x1xf32>
    %331 = vector.broadcast %330 : vector<16x1xf32> to vector<16x32xf32>
    %332 = arith.mulf %322, %331 : vector<16x32xf32>
    %333 = vector.broadcast %315 : vector<1x32xf32> to vector<16x32xf32>
    %334 = arith.mulf %332, %333 : vector<16x32xf32>
    %335 = vector.broadcast %316 : vector<1x32xf32> to vector<16x32xf32>
    %336 = arith.addf %334, %335 : vector<16x32xf32>
    %337 = vector.extract_strided_slice %336 {offsets = [0, 0], sizes = [1, 32], strides = [1, 1]} : vector<16x32xf32> to vector<1x32xf32>
    %338 = vector.extract_strided_slice %336 {offsets = [8, 0], sizes = [1, 32], strides = [1, 1]} : vector<16x32xf32> to vector<1x32xf32>
    %339 = tpu.concatenate %337, %338 in 0 : vector<1x32xf32>, vector<1x32xf32> -> vector<2x32xf32>
    %c320 = arith.constant 320 : index
    %c0_109 = arith.constant 0 : index
    %340 = vector.load %arg2[%c320, %c0_109] : memref<384x128xf32, #tpu.memory_space<vmem>>, vector<32x128xf32>
    %cst_110 = arith.constant dense<0.000000e+00> : vector<2x128xf32>
    %341 = tpu.matmul %339, %340, %cst_110 {dimension_numbers = #tpu.dot_dimension_numbers<[1], [0], [0], [1], [0, 0, 1, 1], [], []>} : vector<2x32xf32>, vector<32x128xf32>, vector<2x128xf32> -> vector<2x128xf32>
    %342 = vector.extract_strided_slice %341 {offsets = [0, 0], sizes = [2, 32], strides = [1, 1]} : vector<2x128xf32> to vector<2x32xf32>
    %c18 = arith.constant 18 : index
    %c0_111 = arith.constant 0 : index
    %343 = vector.load %arg3[%c18, %c0_111] : memref<20x128xf32, #tpu.memory_space<vmem>>, vector<1x32xf32>
    %344 = vector.broadcast %343 : vector<1x32xf32> to vector<2x32xf32>
    %345 = arith.addf %342, %344 : vector<2x32xf32>
    %346 = math.tanh %345 : vector<2x32xf32>
    %c352 = arith.constant 352 : index
    %c0_112 = arith.constant 0 : index
    %347 = vector.load %arg2[%c352, %c0_112] : memref<384x128xf32, #tpu.memory_space<vmem>>, vector<32x128xf32>
    %cst_113 = arith.constant dense<0.000000e+00> : vector<2x128xf32>
    %348 = tpu.matmul %346, %347, %cst_113 {dimension_numbers = #tpu.dot_dimension_numbers<[1], [0], [0], [1], [0, 0, 1, 1], [], []>} : vector<2x32xf32>, vector<32x128xf32>, vector<2x128xf32> -> vector<2x128xf32>
    %349 = vector.extract_strided_slice %348 {offsets = [0, 0], sizes = [2, 4], strides = [1, 1]} : vector<2x128xf32> to vector<2x4xf32>
    %c19 = arith.constant 19 : index
    %c0_114 = arith.constant 0 : index
    %350 = vector.load %arg3[%c19, %c0_114] : memref<20x128xf32, #tpu.memory_space<vmem>>, vector<1x4xf32>
    %351 = vector.broadcast %350 : vector<1x4xf32> to vector<2x4xf32>
    %352 = arith.addf %349, %351 : vector<2x4xf32>
    %c0_115 = arith.constant 0 : index
    %c0_116 = arith.constant 0 : index
    %353 = vector.load %arg4[%c0_115, %c0_116] : memref<2x4xf32, #tpu.memory_space<vmem>>, vector<2x4xf32>
    tpu.vector_store %arg4[%c0_115, %c0_116], %352 {strides = array<i32>} : memref<2x4xf32, #tpu.memory_space<vmem>>, vector<2x4xf32>,
    return
  }
}

</mosaic_0001>

<bundles_post_ra>
// kernel: tpu_custom_call.1
= control target key start
LH: loop header
LB: loop body
LE: loop exit
PB: predicated region body
PF: predicated region fallthrough
CT: control target
= control target key end

     0   :  { %9 = vsyncpa [#allocation3], 0  ;;  %s5182_s0 = inlined_call_operand.hbm [shape: f32[16,32], index: 0, kind: input, shape index: {}]   ;;  %s5183_s1 = inlined_call_operand.hbm [shape: f32[2,8], index: 1, kind: input, shape index: {}]   ;;  %s5184_s2 = inlined_call_operand.hbm [shape: f32[384,128], index: 2, kind: input, shape index: {}]   ;;  %s5185_s3 = inlined_call_operand.hbm [shape: f32[20,128], index: 3, kind: input, shape index: {}]   ;;  %s5186_s4 = inlined_call_operand.hbm [shape: f32[2,4], index: 4, kind: output, shape index: {}]  }
   0x1   :  { %10 = vsyncpa [#allocation6], 0 }
   0x2   :  { %11 = vsyncpa [#allocation9], 0 }
   0x3   :  { %12 = vsyncpa [#allocation4], 0  ;;  %s4707_s15 = smov [#allocation5]   ;;  %s4708_s17 = smov [#allocation2]  }
   0x4   :  { %s31_s16 = sshll.u32 %s4707_s15, 4  ;;  %s18_s18 = sshll.u32 %s4708_s17, 4  ;;  %s32_s16 = int_to_ptr.vmem [resolvable:$true] %s31_s16  ;;  %s19_s18 = int_to_ptr.vmem [resolvable:$true] %s18_s18 }
   0x5   :  { %s4607_s19 = scalar_lea.vmem %s32_s16, 32  ;;  %p4612_p1 = scmp.lt.s32.totalorder %s32_s16, %s32_s16 }
   0x6   :  { %p4608_p0 = scmp.ne.s32.totalorder %s32_s16, %s4607_s19  ;;  %p4613_p2 = scmp.lt.s32.totalorder %s4607_s19, %s4607_s19 }
   0x8   :  { %p4614_p3 = por %p4613_p2, %p4612_p1 }
   0xa   :  { %p4615_p4 = pnand %p4614_p3, %p4608_p0 }
   0xc   :  { %4618 = shalt.err (!%p4615_p4)
}
   0xd   :  { %34 = dma.hbm_to_vmem [thread:$0]  %s5183_s1, 32, %s32_s16, [#allocation6]  }
   0xe   :  { %s4627_s22 = scalar_lea.vmem %s19_s18, 256  ;;  %p4632_p6 = scmp.lt.s32.totalorder %s19_s18, %s19_s18 }
   0xf   :  { %p4628_p5 = scmp.ne.s32.totalorder %s19_s18, %s4627_s22  ;;  %p4633_p7 = scmp.lt.s32.totalorder %s4627_s22, %s4627_s22 }
  0x11   :  { %p4634_p8 = por %p4633_p7, %p4632_p6 }
  0x13   :  { %p4635_p9 = pnand %p4634_p8, %p4628_p5 }
  0x15   :  { %4638 = shalt.err (!%p4635_p9)
}
  0x16   :  { %s4709_s23 = smov 128   ;;  %s4710_s24 = smov 8  }
  0x17   :  { %24 = dma.hbm_to_vmem [thread:$0]  %s5182_s0, 256, %s19_s18, [#allocation3], %s4709_s23, %s4709_s23, %s4710_s24  }
  0x18   :  { %s4711_s27 = smov [#allocation7]   ;;  %s4712_s29 = smov [#allocation8]  }
  0x19   :  { %s40_s28 = sshll.u32 %s4711_s27, 4  ;;  %s52_s30 = sshll.u32 %s4712_s29, 4  ;;  %s41_s28 = int_to_ptr.vmem [resolvable:$true] %s40_s28  ;;  %s53_s30 = int_to_ptr.vmem [resolvable:$true] %s52_s30 }
  0x1a   :  { %s4647_s1 = scalar_lea.vmem %s41_s28, 6144  ;;  %p4652_p11 = scmp.lt.s32.totalorder %s41_s28, %s41_s28 }
  0x1b   :  { %p4648_p10 = scmp.ne.s32.totalorder %s41_s28, %s4647_s1  ;;  %p4653_p12 = scmp.lt.s32.totalorder %s4647_s1, %s4647_s1 }
  0x1d   :  { %p4654_p13 = por %p4653_p12, %p4652_p11 }
  0x1f   :  { %p4655_p0 = pnand %p4654_p13, %p4648_p10 }
  0x21   :  { %4658 = shalt.err (!%p4655_p0)
}
  0x22   :  { %46 = dma.hbm_to_vmem [thread:$0]  %s5184_s2, 6144, %s41_s28, [#allocation6], %s4709_s23, %s4709_s23, %s4710_s24  }
  0x23   :  { %s4667_s7 = scalar_lea.vmem %s53_s30, 384  ;;  %p4672_p2 = scmp.lt.s32.totalorder %s53_s30, %s53_s30 }
  0x24   :  { %p4668_p1 = scmp.ne.s32.totalorder %s53_s30, %s4667_s7  ;;  %p4673_p3 = scmp.lt.s32.totalorder %s4667_s7, %s4667_s7 }
  0x26   :  { %p4674_p4 = por %p4673_p3, %p4672_p2 }
  0x28   :  { %p4675_p5 = pnand %p4674_p4, %p4668_p1 }
  0x2a   :  { %4678 = shalt.err (!%p4675_p5)
}
  0x2b   :  { %58 = dma.hbm_to_vmem [thread:$0]  %s5185_s3, 384, %s53_s30, [#allocation9], %s4709_s23, %s4709_s23, %s4710_s24  }
  0x2c   :  { %4699 = dma.done.wait [#allocation3], 256  }
  0x2d   :  { %4700 = vsyncadd [#allocation3], 4294967040 }
  0x2e   :  { %4701 = dma.done.wait [#allocation6], 6176  }
  0x2f   :  { %4702 = vsyncadd [#allocation6], 4294961120 }
  0x30   :  { %4703 = dma.done.wait [#allocation9], 384  }
  0x31   :  { %4704 = vsyncadd [#allocation9], 4294966912  ;;  %vm75_vm0 = vcmask 261120   ;;  %v71_v0 = vld [vmem:[#allocation2] sm:$0xff]  ;;  %v72_v1 = vld [vmem:[#allocation2 + $0x8] sm:$0xff]  ;;  %v4713_v34 = vmov 0.0   ;;  %v118_v54 = vlaneseq }
  0x32   :  { %v76_v2 = vsel %vm75_vm0, %v71_v0, 0.0  ;;  %v79_v3 = vsel %vm75_vm0, %v72_v1, 0.0  ;;  %v129_v14 = vld [vmem:[#allocation7 + $0x18] sm:$0xff]  ;;  %v128_v15 = vld [vmem:[#allocation7 + $0x10] sm:$0xff]  ;;  %v127_v16 = vld [vmem:[#allocation7 + $0x8] sm:$0xff]  ;;  %4208 = vmatprep.subr.mxu1 %v4713_v34  ;;  %vm4714_vm1 = vmmov 0  }
  0x33   :  { %77 = vadd.xlane.f32.xlu0 %v76_v2  ;;  %4197 = vmatprep.subr.mxu0 %v129_v14  ;;  %v126_v17 = vld [vmem:[#allocation7] sm:$0xff]  ;;  %s4715_s2 = smov 96   ;;  %s4716_s3 = smov 88   ;;  %vm221_vm2 = vcmask 64512   ;;  %v115_v55 = vld [vmem:[#allocation5] sm:$0x3] }
  0x34   :  { %4198 = vmatpush3.msra.mxu0 %v129_v14  ;;  %v3981_v25 = vld [vmem:[#allocation8] ss:$0 sm:$0xff]  ;;  %v3982_v27 = vld [vmem:[#allocation8 + $0x1] ss:$0 sm:$0xff]  ;;  %4210 = vmatprep.mubr.msk.f32.mxu1 %vm4714_vm1, %v4713_v34  ;;  %v3985_v35 = vld [vmem:[#allocation8 + $0x2] ss:$0 sm:$0xff] }
  0x35   :  { %4199 = vmatprep.subr.mxu0 %v128_v15  ;;  %s4717_s9 = smov 120   ;;  %s4718_s10 = smov 72   ;;  %v116_v56 = vsub.f32 1.0, %v115_v55  ;;  %v119_v57 = vshrl.u32 %v118_v54, 7  ;;  %vm1254_vm3 = vcmask 130048   ;;  %vm1256_vm4 = vcmask 195584  }
  0x36   :  { %4200 = vmatpush3.msra.mxu0 %v128_v15  ;;  %s4719_s11 = smov 80   ;;  %s4720_s12 = smov 104   ;;  %vm1829_vm5 = vcmask 523264   ;;  %vm3793_vm6 = vcmask 1040384   ;;  %vm3962_vm7 = vcmask 25600  }
  0x37   :  { %80 = vadd.xlane.f32.xlu0 %v79_v3  ;;  %4201 = vmatprep.subr.mxu0 %v127_v16  ;;  %s4721_s13 = smov 112   ;;  %v117_v58 = vmul.f32 -1e+09, %v116_v56  ;;  %v120_v59 = vsub.s32 0, %v119_v57  ;;  %s4722_s14 = smov 56  }
  0x38   :  { %4202 = vmatpush3.msra.mxu0 %v127_v16  ;;  %s4723_s15 = smov 48   ;;  %s4724_s16 = smov 64  }
  0x39   :  { %4203 = vmatprep.subr.mxu0 %v126_v17  ;;  %v4861_v60 = vrot.slane %v117_v58, %v120_v59  ;;  %s4725_s17 = smov 40   ;;  %s4726_s18 = smov 16  }
  0x3a   :  { %4204 = vmatpush3.msra.mxu0 %v126_v17  ;;  %s4727_s19 = smov 24   ;;  %s4728_s20 = smov [#allocation10]  }
  0x3b   :  { %4218 = vmatprep.subr.mxu0 %v4713_v34  ;;  %s3970_s21 = sshll.u32 %s4728_s20, 4  ;;  %s3971_s21 = int_to_ptr.vmem [resolvable:$true] %s3970_s21 }
  0x3c   :  { %s4679_s22 = scalar_lea.vmem %s3971_s21, 32  ;;  %p4684_p7 = scmp.lt.s32.totalorder %s3971_s21, %s3971_s21 }
  0x3d   :  { %p4680_p6 = scmp.ne.s32.totalorder %s3971_s21, %s4679_s22  ;;  %p4685_p8 = scmp.lt.s32.totalorder %s4679_s22, %s4679_s22 }
  0x3f   :  { %p4686_p9 = por %p4685_p8, %p4684_p7 }
  0x41   :  { %p4687_p10 = pnand %p4686_p9, %p4680_p6 }
  0xbc   :  { %v78_v4 = vpop.xlane.xlu0 %77 }
  0xbd   :  { %v83_v5 = vmul.f32 0.03125, %v78_v4 }
  0xbf   :  { %v85_v6 = vsub.f32 %v71_v0, %v83_v5  ;;  %v124_v5 = vsub.s32 1, %v119_v57 }
  0xc0   :  { %v81_v7 = vpop.xlane.xlu0 %80 }
  0xc1   :  { %v84_v8 = vmul.f32 0.03125, %v81_v7  ;;  %v87_v9 = vmul.f32 %v85_v6, %v85_v6 }
  0xc3   :  { %v86_v10 = vsub.f32 %v72_v1, %v84_v8  ;;  %v89_v11 = vsel %vm75_vm0, %v87_v9, 0.0 }
  0xc4   :  { %90 = vadd.xlane.f32.xlu1 %v89_v11 }
  0xc5   :  { %v88_v12 = vmul.f32 %v86_v10, %v86_v10 }
  0xc7   :  { %v92_v13 = vsel %vm75_vm0, %v88_v12, 0.0 }
  0xc8   :  { %93 = vadd.xlane.f32.xlu1 %v92_v13 }
 0x14d   :  { %v91_v18 = vpop.xlane.xlu1 %90 }
 0x14e   :  { %v95_v19 = vmul.f32 0.03125, %v91_v18 }
 0x150   :  { %v97_v20 = vadd.f32 1e-12, %v95_v19 }
 0x151   :  { %v94_v21 = vpop.xlane.xlu1 %93 }
 0x152   :  { %4505 = vrsqrt.f32 %v97_v20  ;;  %v96_v22 = vmul.f32 0.03125, %v94_v21 }
 0x154   :  { %v98_v23 = vadd.f32 1e-12, %v96_v22 }
 0x156   :  { %4507 = vrsqrt.f32 %v98_v23 }
 0x15f   :  { %v4506_v24 = vpop.eup %4505 }
 0x160   :  { %v101_v26 = vmul.f32 %v4506_v24, %v85_v6 }
 0x162   :  { %v107_v28 = vmul.f32 %v3981_v25, %v101_v26 }
 0x163   :  { %v4508_v29 = vpop.eup %4507 }
 0x164   :  { %v102_v30 = vmul.f32 %v4508_v29, %v86_v10  ;;  %v4773_v31 = vadd.f32 %v3982_v27, %v107_v28  ;;  %v4868_v10 = vrot.slane %v117_v58, %v124_v5 }
 0x166   :  { %v108_v32 = vmul.f32 %v3981_v25, %v102_v30  ;;  %4205 = vmatprep.mubr.msk.f32.mxu0 %vm75_vm0, %v4773_v31 }
 0x168   :  { %v4777_v33 = vadd.f32 %v3982_v27, %v108_v32 }
 0x16a   :  { %4206 = vmatmul.mubr.msk.f32.vlgmr.msra.gmra.mxu0 %vm75_vm0, %v4777_v33 }
 0x16b   :  { %4220 = vmatprep.mubr.msk.f32.mxu0 %vm4714_vm1, %v4713_v34 }
 0x22a   :  { %v4207_v36 = vpop.f32.mrf.mxu0 }
 0x22b   :  { %v4787_v37 = vadd.f32 %v4207_v36, %v3985_v35 }
 0x22c   :  { %v202_v38 = vpop.f32.mrf.mxu0 }
 0x22d   :  { %v4789_v39 = vadd.f32 %v3985_v35, %v202_v38  ;;  %531 = vrot.lane.b32.xlu1 %v4787_v37, %s4715_s2 }
 0x22f   :  { %219 = vrot.lane.b32.xlu0 %v4789_v39, %s4715_s2 }
 0x231   :  { %298 = vrot.lane.b32.xlu1 %v4789_v39, %s4716_s3 }
 0x233   :  { %609 = vrot.lane.b32.xlu0 %v4787_v37, %s4716_s3 }
 0x235   :  { %296 = vrot.lane.b32.xlu1 %v4789_v39, %s4717_s9 }
 0x237   :  { %454 = vrot.lane.b32.xlu0 %v4789_v39, %s4718_s10 }
 0x239   :  { %376 = vrot.lane.b32.xlu1 %v4789_v39, %s4719_s11 }
 0x23b   :  { %452 = vrot.lane.b32.xlu0 %v4789_v39, %s4720_s12 }
 0x23d   :  { %374 = vrot.lane.b32.xlu1 %v4789_v39, %s4721_s13 }
 0x23f   :  { %687 = vrot.lane.b32.xlu0 %v4787_v37, %s4719_s11 }
 0x241   :  { %607 = vrot.lane.b32.xlu1 %v4787_v37, %s4717_s9 }
 0x243   :  { %685 = vrot.lane.b32.xlu0 %v4787_v37, %s4721_s13 }
 0x245   :  { %765 = vrot.lane.b32.xlu1 %v4787_v37, %s4718_s10 }
 0x249   :  { %763 = vrot.lane.b32.xlu1 %v4787_v37, %s4720_s12 }
 0x29f   :  { %v532_v40 = vpop.permute.xlu1 %531 }
 0x2a1   :  { %v220_v41 = vpop.permute.xlu0 %219 }
 0x2a2   :  { %4209 = vmatpush3.xpose.msk.msra.mxu1 %vm221_vm2, %v220_v41 }
 0x2a3   :  { %v299_v42 = vpop.permute.xlu1 %298  ;;  %4213 = vmatprep.subr.mxu1 %v4713_v34 }
 0x2a5   :  { %4211 = vmatmul.mubr.msk.f32.vlgmr.msra.gmra.mxu1 %vm221_vm2, %v4789_v39  ;;  %v610_v43 = vpop.permute.xlu0 %609 }
 0x2a6   :  { %4214 = vmatpush3.xpose.msk.msra.mxu1 %vm221_vm2, %v299_v42  ;;  %4215 = vmatprep.mubr.msk.f32.mxu1 %vm4714_vm1, %v4713_v34 }
 0x2a7   :  { %v297_v44 = vpop.permute.xlu1 %296  ;;  %4223 = vmatprep.subr.mxu1 %v4713_v34 }
 0x2a9   :  { %4216 = vmatmul.mubr.msk.f32.vlgmr.msra.gmra.mxu1 %vm221_vm2, %v297_v44  ;;  %v455_v45 = vpop.permute.xlu0 %454 }
 0x2aa   :  { %4224 = vmatpush3.xpose.msk.msra.mxu1 %vm221_vm2, %v455_v45  ;;  %4225 = vmatprep.mubr.msk.f32.mxu1 %vm4714_vm1, %v4713_v34 }
 0x2ab   :  { %v377_v46 = vpop.permute.xlu1 %376  ;;  %4233 = vmatprep.subr.mxu1 %v4713_v34 }
 0x2ac   :  { %4219 = vmatpush3.xpose.msk.msra.mxu0 %vm221_vm2, %v377_v46 }
 0x2ad   :  { %v453_v47 = vpop.permute.xlu0 %452  ;;  %4228 = vmatprep.subr.mxu0 %v4713_v34 }
 0x2ae   :  { %4226 = vmatmul.mubr.msk.f32.vlgmr.msra.gmra.mxu1 %vm221_vm2, %v453_v47 }
 0x2af   :  { %4234 = vmatpush3.xpose.msk.msra.mxu1 %vm221_vm2, %v610_v43  ;;  %v375_v48 = vpop.permute.xlu1 %374  ;;  %4235 = vmatprep.mubr.msk.f32.mxu1 %vm4714_vm1, %v4713_v34 }
 0x2b0   :  { %4221 = vmatmul.mubr.msk.f32.vlgmr.msra.gmra.mxu0 %vm221_vm2, %v375_v48  ;;  %4243 = vmatprep.subr.mxu1 %v4713_v34 }
 0x2b1   :  { %4229 = vmatpush3.xpose.msk.msra.mxu0 %vm221_vm2, %v532_v40  ;;  %v688_v49 = vpop.permute.xlu0 %687  ;;  %4230 = vmatprep.mubr.msk.f32.mxu0 %vm4714_vm1, %v4713_v34 }
 0x2b2   :  { %4238 = vmatprep.subr.mxu0 %v4713_v34 }
 0x2b3   :  { %v608_v50 = vpop.permute.xlu1 %607 }
 0x2b4   :  { %4231 = vmatmul.mubr.msk.f32.vlgmr.msra.gmra.mxu0 %vm221_vm2, %v4787_v37  ;;  %4236 = vmatmul.mubr.msk.f32.vlgmr.msra.gmra.mxu1 %vm221_vm2, %v608_v50 }
 0x2b5   :  { %4239 = vmatpush3.xpose.msk.msra.mxu0 %vm221_vm2, %v688_v49  ;;  %4240 = vmatprep.mubr.msk.f32.mxu0 %vm4714_vm1, %v4713_v34  ;;  %v686_v51 = vpop.permute.xlu0 %685 }
 0x2b6   :  { %4245 = vmatprep.mubr.msk.f32.mxu1 %vm4714_vm1, %v4713_v34  ;;  %4248 = vmatprep.subr.mxu0 %v4713_v34 }
 0x2b7   :  { %v766_v52 = vpop.permute.xlu1 %765 }
 0x2b8   :  { %4241 = vmatmul.mubr.msk.f32.vlgmr.msra.gmra.mxu0 %vm221_vm2, %v686_v51  ;;  %4244 = vmatpush3.xpose.msk.msra.mxu1 %vm221_vm2, %v766_v52 }
 0x2b9   :  { %4253 = vmatprep.subr.mxu1 %v4713_v34  ;;  %4250 = vmatprep.mubr.msk.f32.mxu0 %vm4714_vm1, %v4713_v34 }
 0x2bb   :  { %v764_v53 = vpop.permute.xlu1 %763 }
 0x2bc   :  { %4246 = vmatmul.mubr.msk.f32.vlgmr.msra.gmra.mxu1 %vm221_vm2, %v764_v53 }
 0x2bd   :  { %4255 = vmatprep.mubr.msk.f32.mxu1 %vm4714_vm1, %v4713_v34 }
 0x365   :  { %v292_v61 = vpop.f32.mrf.mxu1 }
 0x366   :  { %v841_v62 = vadd.f32 %v292_v61, %v4861_v60 }
 0x367   :  { %v4212_v63 = vpop.f32.mrf.mxu1 }
 0x368   :  { %v849_v0 = vsel %vm221_vm2, %v841_v62, -inf }
 0x369   :  { %850 = vmax.xlane.f32.xlu0 %v849_v0  ;;  %v370_v1 = vpop.f32.mrf.mxu1 }
 0x36a   :  { %v842_v2 = vadd.f32 %v370_v1, %v4861_v60 }
 0x36b   :  { %v4217_v3 = vpop.f32.mrf.mxu1 }
 0x36c   :  { %v852_v4 = vsel %vm221_vm2, %v842_v2, -inf }
 0x36d   :  { %853 = vmax.xlane.f32.xlu1 %v852_v4 }
 0x36e   :  { %v526_v6 = vpop.f32.mrf.mxu1 }
 0x36f   :  { %v844_v12 = vadd.f32 %v526_v6, %v4861_v60 }
 0x370   :  { %v448_v7 = vpop.f32.mrf.mxu0  ;;  %v4227_v8 = vpop.f32.mrf.mxu1 }
 0x371   :  { %v843_v9 = vadd.f32 %v448_v7, %v4861_v60  ;;  %v858_v20 = vsel %vm221_vm2, %v844_v12, -inf }
 0x372   :  { %v4222_v11 = vpop.f32.mrf.mxu0 }
 0x373   :  { %v855_v13 = vsel %vm221_vm2, %v843_v9, -inf }
 0x374   :  { %v603_v14 = vpop.f32.mrf.mxu0  ;;  %856 = vmax.xlane.f32.xlu0 %v855_v13  ;;  %v681_v15 = vpop.f32.mrf.mxu1 }
 0x375   :  { %v846_v16 = vadd.f32 %v681_v15, %v4868_v10  ;;  %v845_v19 = vadd.f32 %v603_v14, %v4868_v10 }
 0x376   :  { %v4232_v17 = vpop.f32.mrf.mxu0  ;;  %v4237_v18 = vpop.f32.mrf.mxu1 }
 0x377   :  { %v864_v21 = vsel %vm221_vm2, %v846_v16, -inf  ;;  %v861_v25 = vsel %vm221_vm2, %v845_v19, -inf }
 0x378   :  { %859 = vmax.xlane.f32.xlu0 %v858_v20  ;;  %865 = vmax.xlane.f32.xlu1 %v864_v21  ;;  %v759_v22 = vpop.f32.mrf.mxu0 }
 0x379   :  { %v847_v24 = vadd.f32 %v759_v22, %v4868_v10 }
 0x37a   :  { %v4242_v23 = vpop.f32.mrf.mxu0 }
 0x37b   :  { %v867_v30 = vsel %vm221_vm2, %v847_v24, -inf }
 0x37c   :  { %862 = vmax.xlane.f32.xlu0 %v861_v25  ;;  %v837_v26 = vpop.f32.mrf.mxu1 }
 0x37d   :  { %v848_v27 = vadd.f32 %v837_v26, %v4868_v10 }
 0x37e   :  { %v4247_v28 = vpop.f32.mrf.mxu1 }
 0x37f   :  { %v870_v29 = vsel %vm221_vm2, %v848_v27, -inf }
 0x380   :  { %871 = vmax.xlane.f32.xlu1 %v870_v29  ;;  %868 = vmax.xlane.f32.xlu0 %v867_v30 }
 0x391   :  { %1013 = vrot.lane.b32.xlu1 %v4789_v39, %s4722_s14 }
 0x395   :  { %1089 = vrot.lane.b32.xlu1 %v4789_v39, %s4723_s15 }
 0x396   :  { %937 = vrot.lane.b32.xlu0 %v4789_v39, %s4724_s16 }
 0x399   :  { %1165 = vrot.lane.b32.xlu1 %v4789_v39, %s4725_s17 }
 0x39a   :  { %1258 = vrot.lane.b32.xlu0 %v4787_v37, %s4724_s16 }
 0x39d   :  { %1334 = vrot.lane.b32.xlu1 %v4787_v37, %s4722_s14 }
 0x3f2   :  { %v851_v32 = vpop.xlane.xlu0 %850 }
 0x3f3   :  { %v873_v35 = vsub.f32 %v841_v62, %v851_v32 }
 0x3f5   :  { %v881_v36 = vmul.f32 1.442695, %v873_v35 }
 0x3f6   :  { %v854_v38 = vpop.xlane.xlu1 %853 }
 0x3f7   :  { %4509 = vpow2.f32 %v881_v36  ;;  %v874_v40 = vsub.f32 %v842_v2, %v854_v38 }
 0x3f9   :  { %v883_v41 = vmul.f32 1.442695, %v874_v40 }
 0x3fb   :  { %4511 = vpow2.f32 %v883_v41 }
 0x3fd   :  { %v857_v42 = vpop.xlane.xlu0 %856 }
 0x3fe   :  { %v875_v43 = vsub.f32 %v843_v9, %v857_v42 }
 0x400   :  { %v885_v44 = vmul.f32 1.442695, %v875_v43 }
 0x401   :  { %v866_v45 = vpop.xlane.xlu1 %865  ;;  %v860_v46 = vpop.xlane.xlu0 %859 }
 0x402   :  { %4513 = vpow2.f32 %v885_v44  ;;  %v878_v39 = vsub.f32 %v846_v16, %v866_v45  ;;  %v876_v47 = vsub.f32 %v844_v12, %v860_v46 }
 0x404   :  { %v4510_v48 = vpop.eup %4509  ;;  %v887_v49 = vmul.f32 1.442695, %v876_v47  ;;  %v891_v50 = vmul.f32 1.442695, %v878_v39 }
 0x405   :  { %v863_v51 = vpop.xlane.xlu0 %862  ;;  %v897_v52 = vsel %vm221_vm2, %v4510_v48, 0.0 }
 0x406   :  { %v877_v53 = vsub.f32 %v845_v19, %v863_v51  ;;  %898 = vadd.xlane.f32.xlu0 %v897_v52  ;;  %4515 = vpow2.f32 %v887_v49  ;;  %v1580_v51 = vld [vmem:[#allocation7 + $0x38] sm:$0xff] }
 0x407   :  { %4517 = vpow2.f32 %v891_v50 }
 0x408   :  { %v4512_v54 = vpop.eup %4511  ;;  %v889_v55 = vmul.f32 1.442695, %v877_v53  ;;  %v1579_v53 = vld [vmem:[#allocation7 + $0x30] sm:$0xff] }
 0x409   :  { %v872_v56 = vpop.xlane.xlu1 %871  ;;  %v869_v57 = vpop.xlane.xlu0 %868  ;;  %v900_v58 = vsel %vm221_vm2, %v4512_v54, 0.0 }
 0x40a   :  { %4519 = vpow2.f32 %v889_v55  ;;  %v880_v59 = vsub.f32 %v848_v27, %v872_v56  ;;  %v879_v61 = vsub.f32 %v847_v24, %v869_v57  ;;  %901 = vadd.xlane.f32.xlu1 %v900_v58  ;;  %v1577_v56 = vld [vmem:[#allocation7 + $0x20] sm:$0xff] }
 0x40c   :  { %v895_v62 = vmul.f32 1.442695, %v880_v59  ;;  %v893_v63 = vmul.f32 1.442695, %v879_v61 }
 0x40d   :  { %v1014_v0 = vpop.permute.xlu1 %1013  ;;  %v938_v1 = vpop.permute.xlu0 %937 }
 0x40e   :  { %4521 = vpow2.f32 %v895_v62  ;;  %4249 = vmatpush3.msra.mxu0 %v938_v1  ;;  %4254 = vmatpush3.msra.mxu1 %v1014_v0 }
 0x40f   :  { %v4514_v2 = vpop.eup %4513  ;;  %4523 = vpow2.f32 %v893_v63  ;;  %4258 = vmatprep.subr.mxu0 %v4713_v34  ;;  %4263 = vmatprep.subr.mxu1 %v4713_v34 }
 0x410   :  { %v903_v3 = vsel %vm221_vm2, %v4514_v2, 0.0 }
 0x411   :  { %904 = vadd.xlane.f32.xlu0 %v903_v3  ;;  %v1090_v15 = vpop.permute.xlu1 %1089  ;;  %v1259_v17 = vpop.permute.xlu0 %1258 }
 0x413   :  { %v4516_v4 = vpop.eup %4515 }
 0x414   :  { %v906_v5 = vsel %vm221_vm2, %v4516_v4, 0.0  ;;  %v4518_v6 = vpop.eup %4517 }
 0x415   :  { %907 = vadd.xlane.f32.xlu1 %v906_v5  ;;  %v912_v9 = vsel %vm221_vm2, %v4518_v6, 0.0  ;;  %v1166_v16 = vpop.permute.xlu1 %1165 }
 0x417   :  { %v4520_v7 = vpop.eup %4519 }
 0x418   :  { %v909_v8 = vsel %vm221_vm2, %v4520_v7, 0.0 }
 0x419   :  { %910 = vadd.xlane.f32.xlu0 %v909_v8  ;;  %913 = vadd.xlane.f32.xlu1 %v912_v9  ;;  %v1335_v18 = vpop.permute.xlu1 %1334 }
 0x41b   :  { %v4901_v11 = vpop.eup %4521 }
 0x41c   :  { %v4903_v12 = vpop.eup %4523  ;;  %v918_v13 = vsel %vm221_vm2, %v4901_v11, 0.0 }
 0x41d   :  { %v915_v14 = vsel %vm221_vm2, %v4903_v12, 0.0  ;;  %919 = vadd.xlane.f32.xlu1 %v918_v13 }
 0x41e   :  { %916 = vadd.xlane.f32.xlu0 %v915_v14 }
 0x42e   :  { %1486 = vrot.lane.b32.xlu1 %v4787_v37, %s4725_s17 }
 0x434   :  { %1410 = vrot.lane.b32.xlu0 %v4787_v37, %s4723_s15 }
 0x48f   :  { %v899_v19 = vpop.xlane.xlu0 %898 }
 0x490   :  { %4525 = vrcp.f32 %v899_v19 }
 0x493   :  { %v902_v20 = vpop.xlane.xlu1 %901 }
 0x494   :  { %4527 = vrcp.f32 %v902_v20 }
 0x49a   :  { %v905_v21 = vpop.xlane.xlu0 %904 }
 0x49b   :  { %4529 = vrcp.f32 %v905_v21 }
 0x49d   :  { %v4526_v22 = vpop.eup %4525 }
 0x49e   :  { %v929_v23 = vmul.f32 %v4526_v22, %v4510_v48  ;;  %v908_v24 = vpop.xlane.xlu1 %907 }
 0x49f   :  { %4531 = vrcp.f32 %v908_v24 }
 0x4a0   :  { %4251 = vmatmul.mubr.msk.f32.vlgmr.msra.gmra.mxu0 %vm221_vm2, %v929_v23 }
 0x4a1   :  { %v4528_v25 = vpop.eup %4527  ;;  %4259 = vmatpush3.msra.mxu0 %v1090_v15  ;;  %4260 = vmatprep.mubr.msk.f32.mxu0 %vm4714_vm1, %v4713_v34 }
 0x4a2   :  { %v911_v37 = vpop.xlane.xlu0 %910  ;;  %v930_v26 = vmul.f32 %v4528_v25, %v4512_v54  ;;  %4268 = vmatprep.subr.mxu0 %v4713_v34  ;;  %v914_v27 = vpop.xlane.xlu1 %913  ;;  %v1578_v54 = vld [vmem:[#allocation7 + $0x28] sm:$0xff] }
 0x4a3   :  { %4533 = vrcp.f32 %v911_v37 }
 0x4a4   :  { %4535 = vrcp.f32 %v914_v27  ;;  %4256 = vmatmul.mubr.msk.f32.vlgmr.msra.gmra.mxu1 %vm221_vm2, %v930_v26 }
 0x4a5   :  { %4264 = vmatpush3.msra.mxu1 %v1166_v16  ;;  %4265 = vmatprep.mubr.msk.f32.mxu1 %vm4714_vm1, %v4713_v34 }
 0x4a6   :  { %4273 = vmatprep.subr.mxu1 %v4713_v34  ;;  %v920_v28 = vpop.xlane.xlu1 %919 }
 0x4a7   :  { %v917_v29 = vpop.xlane.xlu0 %916  ;;  %4537 = vrcp.f32 %v920_v28 }
 0x4a8   :  { %v4530_v30 = vpop.eup %4529  ;;  %4539 = vrcp.f32 %v917_v29 }
 0x4a9   :  { %v931_v32 = vmul.f32 %v4530_v30, %v4514_v2 }
 0x4aa   :  { %v1487_v44 = vpop.permute.xlu1 %1486 }
 0x4ab   :  { %4261 = vmatmul.mubr.msk.f32.vlgmr.msra.gmra.mxu0 %vm221_vm2, %v931_v32  ;;  %v1411_v43 = vpop.permute.xlu0 %1410 }
 0x4ac   :  { %4269 = vmatpush3.msra.mxu0 %v1259_v17  ;;  %4270 = vmatprep.mubr.msk.f32.mxu0 %vm4714_vm1, %v4713_v34  ;;  %v4532_v35 = vpop.eup %4531 }
 0x4ad   :  { %4278 = vmatprep.subr.mxu0 %v4713_v34  ;;  %v932_v36 = vmul.f32 %v4532_v35, %v4516_v4 }
 0x4af   :  { %4266 = vmatmul.mubr.msk.f32.vlgmr.msra.gmra.mxu1 %vm221_vm2, %v932_v36 }
 0x4b0   :  { %v4534_v38 = vpop.eup %4533  ;;  %4274 = vmatpush3.msra.mxu1 %v1335_v18  ;;  %4275 = vmatprep.mubr.msk.f32.mxu1 %vm4714_vm1, %v4713_v34  ;;  %v4012_v18 = vld [vmem:[#allocation8 + $0x3] ss:$0 sm:$0xff] }
 0x4b1   :  { %v4536_v40 = vpop.eup %4535  ;;  %v933_v41 = vmul.f32 %v4534_v38, %v4520_v7  ;;  %4283 = vmatprep.subr.mxu1 %v4713_v34 }
 0x4b2   :  { %v934_v42 = vmul.f32 %v4536_v40, %v4518_v6  ;;  %v1714_v40 = vld [vmem:[#allocation7 + $0x58] sm:$0xff] }
 0x4b3   :  { %4271 = vmatmul.mubr.msk.f32.vlgmr.msra.gmra.mxu0 %vm221_vm2, %v933_v41  ;;  %v1712_v41 = vld [vmem:[#allocation7 + $0x48] sm:$0xff] }
 0x4b4   :  { %4276 = vmatmul.mubr.msk.f32.vlgmr.msra.gmra.mxu1 %vm221_vm2, %v934_v42  ;;  %4279 = vmatpush3.msra.mxu0 %v1411_v43  ;;  %v4538_v45 = vpop.eup %4537  ;;  %v1711_v42 = vld [vmem:[#allocation7 + $0x40] sm:$0xff] }
 0x4b5   :  { %4284 = vmatpush3.msra.mxu1 %v1487_v44  ;;  %4280 = vmatprep.mubr.msk.f32.mxu0 %vm4714_vm1, %v4713_v34  ;;  %v4540_v46 = vpop.eup %4539  ;;  %v936_v39 = vmul.f32 %v4538_v45, %v4901_v11 }
 0x4b6   :  { %4285 = vmatprep.mubr.msk.f32.mxu1 %vm4714_vm1, %v4713_v34  ;;  %v935_v47 = vmul.f32 %v4540_v46, %v4903_v12  ;;  %4288 = vmatprep.subr.mxu0 %v1580_v51 }
 0x4b7   :  { %4299 = vmatprep.subr.mxu1 %v1714_v40 }
 0x4b8   :  { %4286 = vmatmul.mubr.msk.f32.vlgmr.msra.gmra.mxu1 %vm221_vm2, %v936_v39  ;;  %4281 = vmatmul.mubr.msk.f32.vlgmr.msra.gmra.mxu0 %vm221_vm2, %v935_v47 }
 0x4b9   :  { %4289 = vmatpush3.msra.mxu0 %v1580_v51  ;;  %4300 = vmatpush3.msra.mxu1 %v1714_v40  ;;  %v4014_v51 = vld [vmem:[#allocation8 + $0x5] ss:$0 sm:$0xff] }
 0x4ba   :  { %4290 = vmatprep.subr.mxu0 %v1579_v53 }
 0x4bb   :  { %4291 = vmatpush3.msra.mxu0 %v1579_v53 }
 0x4bc   :  { %4292 = vmatprep.subr.mxu0 %v1578_v54 }
 0x4bd   :  { %4293 = vmatpush3.msra.mxu0 %v1578_v54 }
 0x4be   :  { %4294 = vmatprep.subr.mxu0 %v1577_v56 }
 0x4bf   :  { %4295 = vmatpush3.msra.mxu0 %v1577_v56 }
 0x560   :  { %v1009_v48 = vpop.f32.mrf.mxu0 }
 0x562   :  { %v4252_v49 = vpop.f32.mrf.mxu0 }
 0x563   :  { %v4013_v49 = vld [vmem:[#allocation8 + $0x4] ss:$0 sm:$0xff] }
 0x564   :  { %v1085_v50 = vpop.f32.mrf.mxu1 }
 0x565   :  { %1242 = vrot.lane.b32.xlu0 %v1085_v50, %s4710_s24 }
 0x566   :  { %v4257_v52 = vpop.f32.mrf.mxu1 }
 0x56b   :  { %v1161_v55 = vpop.f32.mrf.mxu0 }
 0x56c   :  { %1246 = vrot.lane.b32.xlu1 %v1161_v55, %s4726_s18 }
 0x56d   :  { %v4262_v57 = vpop.f32.mrf.mxu0 }
 0x56f   :  { %v1237_v58 = vpop.f32.mrf.mxu1 }
 0x570   :  { %1250 = vrot.lane.b32.xlu1 %v1237_v58, %s4727_s19  ;;  %v1828_v58 = vld [vmem:[#allocation7 + $0x98] sm:$0xff] }
 0x571   :  { %v4267_v59 = vpop.f32.mrf.mxu1  ;;  %4310 = vmatprep.subr.mxu0 %v1828_v58 }
 0x572   :  { %v1827_v59 = vld [vmem:[#allocation7 + $0x90] sm:$0xff] }
 0x573   :  { %v1330_v61 = vpop.f32.mrf.mxu0 }
 0x574   :  { %v1406_v62 = vpop.f32.mrf.mxu1 }
 0x575   :  { %1563 = vrot.lane.b32.xlu0 %v1406_v62, %s4710_s24  ;;  %v4272_v63 = vpop.f32.mrf.mxu0  ;;  %v1825_v62 = vld [vmem:[#allocation7 + $0x80] sm:$0xff] }
 0x576   :  { %v4277_v0 = vpop.f32.mrf.mxu1  ;;  %v1824_v63 = vld [vmem:[#allocation7 + $0x78] sm:$0xff] }
 0x577   :  { %v1823_v0 = vld [vmem:[#allocation7 + $0x70] sm:$0xff] }
 0x578   :  { %v1558_v1 = vpop.f32.mrf.mxu1  ;;  %v1482_v2 = vpop.f32.mrf.mxu0 }
 0x579   :  { %1571 = vrot.lane.b32.xlu1 %v1558_v1, %s4727_s19  ;;  %1567 = vrot.lane.b32.xlu0 %v1482_v2, %s4726_s18  ;;  %v1822_v1 = vld [vmem:[#allocation7 + $0x68] sm:$0xff]  ;;  %v1821_v2 = vld [vmem:[#allocation7 + $0x60] sm:$0xff] }
 0x57a   :  { %v4287_v3 = vpop.f32.mrf.mxu1  ;;  %v4282_v4 = vpop.f32.mrf.mxu0 }
 0x57b   :  { %v4017_v3 = vld [vmem:[#allocation8 + $0x6] ss:$0 sm:$0xff] }
 0x5d7   :  { %v1243_v6 = vpop.permute.xlu0 %1242 }
 0x5d8   :  { %v1253_v7 = vsel %vm221_vm2, %v1009_v48, %v1243_v6 }
 0x5de   :  { %v1247_v5 = vpop.permute.xlu1 %1246 }
 0x5df   :  { %v1255_v8 = vsel %vm1254_vm3, %v1253_v7, %v1247_v5 }
 0x5e2   :  { %v1251_v9 = vpop.permute.xlu1 %1250 }
 0x5e3   :  { %v1257_v11 = vsel %vm1256_vm4, %v1255_v8, %v1251_v9 }
 0x5e4   :  { %4296 = vmatprep.mubr.msk.f32.mxu0 %vm75_vm0, %v1257_v11 }
 0x5e7   :  { %v1564_v12 = vpop.permute.xlu0 %1563 }
 0x5e8   :  { %v1574_v14 = vsel %vm221_vm2, %v1330_v61, %v1564_v12  ;;  %v1826_v61 = vld [vmem:[#allocation7 + $0x88] sm:$0xff] }
 0x5eb   :  { %v1572_v13 = vpop.permute.xlu1 %1571  ;;  %v1568_v15 = vpop.permute.xlu0 %1567 }
 0x5ec   :  { %v1575_v16 = vsel %vm1254_vm3, %v1574_v14, %v1568_v15 }
 0x5ed   :  { %v1576_v17 = vsel %vm1256_vm4, %v1575_v16, %v1572_v13 }
 0x5ee   :  { %4297 = vmatmul.mubr.msk.f32.vlgmr.msra.gmra.mxu0 %vm75_vm0, %v1576_v17 }
 0x5ef   :  { %4311 = vmatpush3.msra.mxu0 %v1828_v58  ;;  %v4021_v58 = vld [vmem:[#allocation8 + $0x8] ss:$0 sm:$0xff] }
 0x5f0   :  { %4312 = vmatprep.subr.mxu0 %v1827_v59 }
 0x5f1   :  { %4313 = vmatpush3.msra.mxu0 %v1827_v59 }
 0x5f2   :  { %4314 = vmatprep.subr.mxu0 %v1826_v61 }
 0x5f3   :  { %4315 = vmatpush3.msra.mxu0 %v1826_v61 }
 0x5f4   :  { %4316 = vmatprep.subr.mxu0 %v1825_v62 }
 0x5f5   :  { %4317 = vmatpush3.msra.mxu0 %v1825_v62 }
 0x5f6   :  { %4318 = vmatprep.subr.mxu0 %v1824_v63 }
 0x5f7   :  { %4319 = vmatpush3.msra.mxu0 %v1824_v63 }
 0x5f8   :  { %4320 = vmatprep.subr.mxu0 %v1823_v0 }
 0x5f9   :  { %4321 = vmatpush3.msra.mxu0 %v1823_v0  ;;  %v4022_v0 = vld [vmem:[#allocation8 + $0x9] ss:$0 sm:$0xff] }
 0x5fa   :  { %4322 = vmatprep.subr.mxu0 %v1822_v1 }
 0x5fb   :  { %4323 = vmatpush3.msra.mxu0 %v1822_v1 }
 0x5fc   :  { %4324 = vmatprep.subr.mxu0 %v1821_v2 }
 0x5fd   :  { %4325 = vmatpush3.msra.mxu0 %v1821_v2 }
 0x5fe   :  { %4350 = vmatprep.subr.mxu0 %v4713_v34 }
 0x6ae   :  { %v4298_v19 = vpop.f32.mrf.mxu0 }
 0x6af   :  { %v1668_v20 = vadd.f32 %v4298_v19, %v4012_v18 }
 0x6b0   :  { %v1653_v21 = vpop.f32.mrf.mxu0 }
 0x6b1   :  { %v1667_v22 = vadd.f32 %v4012_v18, %v1653_v21  ;;  %v1670_v23 = vadd.f32 %v1668_v20, %v4777_v33 }
 0x6b3   :  { %v1676_v24 = vsel %vm75_vm0, %v1670_v23, 0.0  ;;  %v1669_v25 = vadd.f32 %v1667_v22, %v4773_v31  ;;  %v1713_v31 = vld [vmem:[#allocation7 + $0x50] sm:$0xff] }
 0x6b4   :  { %1677 = vadd.xlane.f32.xlu1 %v1676_v24  ;;  %4301 = vmatprep.subr.mxu1 %v1713_v31 }
 0x6b5   :  { %v1673_v37 = vsel %vm75_vm0, %v1669_v25, 0.0  ;;  %4302 = vmatpush3.msra.mxu1 %v1713_v31 }
 0x6b6   :  { %1674 = vadd.xlane.f32.xlu0 %v1673_v37  ;;  %4303 = vmatprep.subr.mxu1 %v1712_v41 }
 0x6b7   :  { %4304 = vmatpush3.msra.mxu1 %v1712_v41 }
 0x6b8   :  { %4305 = vmatprep.subr.mxu1 %v1711_v42 }
 0x6b9   :  { %4306 = vmatpush3.msra.mxu1 %v1711_v42 }
 0x73d   :  { %v1678_v26 = vpop.xlane.xlu1 %1677 }
 0x73e   :  { %v1680_v27 = vmul.f32 0.03125, %v1678_v26  ;;  %v4020_v26 = vld [vmem:[#allocation8 + $0x7] ss:$0 sm:$0xff] }
 0x73f   :  { %v1675_v28 = vpop.xlane.xlu0 %1674 }
 0x740   :  { %v1679_v29 = vmul.f32 0.03125, %v1675_v28  ;;  %v1682_v30 = vsub.f32 %v1670_v23, %v1680_v27 }
 0x742   :  { %v1681_v32 = vsub.f32 %v1669_v25, %v1679_v29  ;;  %v1684_v38 = vmul.f32 %v1682_v30, %v1682_v30 }
 0x744   :  { %v1683_v35 = vmul.f32 %v1681_v32, %v1681_v32  ;;  %v1688_v33 = vsel %vm75_vm0, %v1684_v38, 0.0 }
 0x746   :  { %v1685_v36 = vsel %vm75_vm0, %v1683_v35, 0.0 }
 0x747   :  { %1686 = vadd.xlane.f32.xlu0 %v1685_v36 }
 0x74b   :  { %1689 = vadd.xlane.f32.xlu0 %v1688_v33 }
 0x7d0   :  { %v1687_v43 = vpop.xlane.xlu0 %1686 }
 0x7d1   :  { %v1691_v44 = vmul.f32 0.03125, %v1687_v43 }
 0x7d3   :  { %v1693_v45 = vadd.f32 1e-12, %v1691_v44 }
 0x7d4   :  { %v1690_v46 = vpop.xlane.xlu0 %1689 }
 0x7d5   :  { %4541 = vrsqrt.f32 %v1693_v45  ;;  %v1692_v39 = vmul.f32 0.03125, %v1690_v46 }
 0x7d7   :  { %v1694_v47 = vadd.f32 1e-12, %v1692_v39 }
 0x7d9   :  { %4543 = vrsqrt.f32 %v1694_v47  ;;  %v1963_v47 = vld [vmem:[#allocation7 + $0xb8] sm:$0xff] }
 0x7da   :  { %4329 = vmatprep.subr.mxu1 %v1963_v47 }
 0x7e2   :  { %v4542_v48 = vpop.eup %4541 }
 0x7e3   :  { %v1697_v50 = vmul.f32 %v4542_v48, %v1681_v32  ;;  %v1962_v48 = vld [vmem:[#allocation7 + $0xb0] sm:$0xff] }
 0x7e5   :  { %v1703_v52 = vmul.f32 %v4013_v49, %v1697_v50  ;;  %v1960_v50 = vld [vmem:[#allocation7 + $0xa0] sm:$0xff] }
 0x7e6   :  { %v4544_v53 = vpop.eup %4543 }
 0x7e7   :  { %v1698_v54 = vmul.f32 %v4544_v53, %v1682_v30  ;;  %v4959_v55 = vadd.f32 %v4014_v51, %v1703_v52 }
 0x7e9   :  { %v1704_v56 = vmul.f32 %v4013_v49, %v1698_v54  ;;  %4307 = vmatprep.mubr.msk.f32.mxu1 %vm75_vm0, %v4959_v55  ;;  %v1961_v49 = vld [vmem:[#allocation7 + $0xa8] sm:$0xff] }
 0x7eb   :  { %v1710_v57 = vadd.f32 %v4014_v51, %v1704_v56 }
 0x7ed   :  { %4308 = vmatmul.mubr.msk.f32.vlgmr.msra.gmra.mxu1 %vm75_vm0, %v1710_v57 }
 0x7ee   :  { %4330 = vmatpush3.msra.mxu1 %v1963_v47 }
 0x7ef   :  { %4331 = vmatprep.subr.mxu1 %v1962_v48 }
 0x7f0   :  { %4332 = vmatpush3.msra.mxu1 %v1962_v48 }
 0x7f1   :  { %4333 = vmatprep.subr.mxu1 %v1961_v49 }
 0x7f2   :  { %4334 = vmatpush3.msra.mxu1 %v1961_v49 }
 0x7f3   :  { %4335 = vmatprep.subr.mxu1 %v1960_v50 }
 0x7f4   :  { %4336 = vmatpush3.msra.mxu1 %v1960_v50 }
 0x7f5   :  { %4340 = vmatprep.subr.mxu1 %v4713_v34 }
 0x8ad   :  { %v4309_v4 = vpop.f32.mrf.mxu1 }
 0x8ae   :  { %v1802_v5 = vadd.f32 %v4309_v4, %v4017_v3  ;;  %v4025_v4 = vld [vmem:[#allocation8 + $0xa] ss:$0 sm:$0xff] }
 0x8af   :  { %v1787_v6 = vpop.f32.mrf.mxu1 }
 0x8b0   :  { %v1804_v7 = vmul.f32 %v1802_v5, %v1802_v5  ;;  %v1801_v8 = vadd.f32 %v4017_v3, %v1787_v6 }
 0x8b2   :  { %v1806_v9 = vmul.f32 %v1804_v7, %v1802_v5  ;;  %v1803_v11 = vmul.f32 %v1801_v8, %v1801_v8 }
 0x8b4   :  { %v1808_v12 = vmul.f32 0.044715, %v1806_v9  ;;  %v1805_v13 = vmul.f32 %v1803_v11, %v1801_v8 }
 0x8b6   :  { %v1810_v14 = vadd.f32 %v1808_v12, %v1802_v5  ;;  %v1807_v15 = vmul.f32 0.044715, %v1805_v13 }
 0x8b8   :  { %v1812_v16 = vmul.f32 0.7978846, %v1810_v14  ;;  %v1809_v17 = vadd.f32 %v1807_v15, %v1801_v8 }
 0x8ba   :  { %4545 = vtanh.f32 %v1812_v16  ;;  %v1811_v18 = vmul.f32 0.7978846, %v1809_v17 }
 0x8bc   :  { %4547 = vtanh.f32 %v1811_v18 }
 0x8c7   :  { %v4546_v19 = vpop.eup %4545 }
 0x8c8   :  { %v1816_v20 = vadd.f32 1.0, %v4546_v19 }
 0x8c9   :  { %v4548_v21 = vpop.eup %4547 }
 0x8ca   :  { %v1815_v22 = vadd.f32 1.0, %v4548_v21  ;;  %v1818_v23 = vmul.f32 0.5, %v1816_v20 }
 0x8cc   :  { %v1817_v24 = vmul.f32 0.5, %v1815_v22  ;;  %v1820_v37 = vmul.f32 %v1818_v23, %v1802_v5 }
 0x8ce   :  { %v1819_v25 = vmul.f32 %v1817_v24, %v1801_v8 }
 0x8d0   :  { %4326 = vmatprep.mubr.msk.f32.mxu0 %vm1829_vm5, %v1819_v25 }
 0x8d1   :  { %4327 = vmatmul.mubr.msk.f32.vlgmr.msra.gmra.mxu0 %vm1829_vm5, %v1820_v37 }
 0x8d2   :  { %4352 = vmatprep.mubr.msk.f32.mxu0 %vm4714_vm1, %v4713_v34 }
 0x991   :  { %v4328_v27 = vpop.f32.mrf.mxu0 }
 0x992   :  { %v1917_v28 = vadd.f32 %v4328_v27, %v4020_v26 }
 0x993   :  { %v1902_v29 = vpop.f32.mrf.mxu0 }
 0x994   :  { %v1916_v30 = vadd.f32 %v4020_v26, %v1902_v29  ;;  %v1919_v32 = vadd.f32 %v1917_v28, %v1710_v57 }
 0x996   :  { %v1925_v35 = vsel %vm75_vm0, %v1919_v32, 0.0  ;;  %v1918_v36 = vadd.f32 %v1916_v30, %v4959_v55 }
 0x997   :  { %1926 = vadd.xlane.f32.xlu1 %v1925_v35 }
 0x998   :  { %v1922_v38 = vsel %vm75_vm0, %v1918_v36, 0.0 }
 0x999   :  { %1923 = vadd.xlane.f32.xlu0 %v1922_v38 }
 0xa20   :  { %v1927_v33 = vpop.xlane.xlu1 %1926 }
 0xa21   :  { %v1929_v40 = vmul.f32 0.03125, %v1927_v33 }
 0xa22   :  { %v1924_v31 = vpop.xlane.xlu0 %1923 }
 0xa23   :  { %v1931_v41 = vsub.f32 %v1919_v32, %v1929_v40  ;;  %v1928_v42 = vmul.f32 0.03125, %v1924_v31 }
 0xa25   :  { %v1930_v43 = vsub.f32 %v1918_v36, %v1928_v42  ;;  %v1933_v44 = vmul.f32 %v1931_v41, %v1931_v41 }
 0xa27   :  { %v1937_v45 = vsel %vm75_vm0, %v1933_v44, 0.0  ;;  %v1932_v46 = vmul.f32 %v1930_v43, %v1930_v43 }
 0xa28   :  { %1938 = vadd.xlane.f32.xlu1 %v1937_v45 }
 0xa29   :  { %v1934_v39 = vsel %vm75_vm0, %v1932_v46, 0.0 }
 0xa2a   :  { %1935 = vadd.xlane.f32.xlu0 %v1934_v39 }
 0xab1   :  { %v1939_v51 = vpop.xlane.xlu1 %1938 }
 0xab2   :  { %v1941_v52 = vmul.f32 0.03125, %v1939_v51 }
 0xab3   :  { %v1936_v53 = vpop.xlane.xlu0 %1935 }
 0xab4   :  { %v1943_v54 = vadd.f32 1e-12, %v1941_v52  ;;  %v1940_v55 = vmul.f32 0.03125, %v1936_v53 }
 0xab6   :  { %4549 = vrsqrt.f32 %v1943_v54  ;;  %v1942_v56 = vadd.f32 1e-12, %v1940_v55 }
 0xab8   :  { %4551 = vrsqrt.f32 %v1942_v56 }
 0xac3   :  { %v4550_v57 = vpop.eup %4549 }
 0xac4   :  { %v1947_v59 = vmul.f32 %v4550_v57, %v1931_v41 }
 0xac5   :  { %v4552_v61 = vpop.eup %4551 }
 0xac6   :  { %v1946_v62 = vmul.f32 %v4552_v61, %v1930_v43  ;;  %v1953_v63 = vmul.f32 %v4021_v58, %v1947_v59 }
 0xac8   :  { %v1952_v1 = vmul.f32 %v4021_v58, %v1946_v62  ;;  %v4977_v3 = vadd.f32 %v4022_v0, %v1953_v63 }
 0xaca   :  { %v4975_v2 = vadd.f32 %v4022_v0, %v1952_v1 }
 0xacc   :  { %4337 = vmatprep.mubr.msk.f32.mxu1 %vm75_vm0, %v4975_v2 }
 0xacd   :  { %4338 = vmatmul.mubr.msk.f32.vlgmr.msra.gmra.mxu1 %vm75_vm0, %v4977_v3 }
 0xace   :  { %4342 = vmatprep.mubr.msk.f32.mxu1 %vm4714_vm1, %v4713_v34 }
 0xb8d   :  { %v4339_v5 = vpop.f32.mrf.mxu1 }
 0xb8e   :  { %v4985_v6 = vadd.f32 %v4339_v5, %v4025_v4 }
 0xb8f   :  { %v2036_v7 = vpop.f32.mrf.mxu1 }
 0xb90   :  { %v4987_v8 = vadd.f32 %v4025_v4, %v2036_v7  ;;  %2364 = vrot.lane.b32.xlu1 %v4985_v6, %s4715_s2 }
 0xb92   :  { %2053 = vrot.lane.b32.xlu0 %v4987_v8, %s4715_s2 }
 0xb94   :  { %2131 = vrot.lane.b32.xlu1 %v4987_v8, %s4716_s3 }
 0xb96   :  { %2442 = vrot.lane.b32.xlu0 %v4985_v6, %s4716_s3 }
 0xb98   :  { %2129 = vrot.lane.b32.xlu1 %v4987_v8, %s4717_s9 }
 0xb9a   :  { %2287 = vrot.lane.b32.xlu0 %v4987_v8, %s4718_s10 }
 0xb9c   :  { %2209 = vrot.lane.b32.xlu1 %v4987_v8, %s4719_s11 }
 0xb9e   :  { %2285 = vrot.lane.b32.xlu0 %v4987_v8, %s4720_s12 }
 0xba0   :  { %2207 = vrot.lane.b32.xlu1 %v4987_v8, %s4721_s13 }
 0xba2   :  { %2520 = vrot.lane.b32.xlu0 %v4985_v6, %s4719_s11 }
 0xba4   :  { %2440 = vrot.lane.b32.xlu1 %v4985_v6, %s4717_s9 }
 0xba6   :  { %2518 = vrot.lane.b32.xlu0 %v4985_v6, %s4721_s13 }
 0xba8   :  { %2598 = vrot.lane.b32.xlu1 %v4985_v6, %s4718_s10 }
 0xbac   :  { %2596 = vrot.lane.b32.xlu1 %v4985_v6, %s4720_s12 }
 0xc02   :  { %v2365_v9 = vpop.permute.xlu1 %2364 }
 0xc04   :  { %v2054_v11 = vpop.permute.xlu0 %2053 }
 0xc05   :  { %4341 = vmatpush3.xpose.msk.msra.mxu1 %vm221_vm2, %v2054_v11 }
 0xc06   :  { %v2132_v12 = vpop.permute.xlu1 %2131  ;;  %4345 = vmatprep.subr.mxu1 %v4713_v34 }
 0xc08   :  { %4343 = vmatmul.mubr.msk.f32.vlgmr.msra.gmra.mxu1 %vm221_vm2, %v4987_v8  ;;  %v2443_v13 = vpop.permute.xlu0 %2442 }
 0xc09   :  { %4346 = vmatpush3.xpose.msk.msra.mxu1 %vm221_vm2, %v2132_v12  ;;  %4347 = vmatprep.mubr.msk.f32.mxu1 %vm4714_vm1, %v4713_v34 }
 0xc0a   :  { %v2130_v14 = vpop.permute.xlu1 %2129  ;;  %4355 = vmatprep.subr.mxu1 %v4713_v34 }
 0xc0c   :  { %4348 = vmatmul.mubr.msk.f32.vlgmr.msra.gmra.mxu1 %vm221_vm2, %v2130_v14  ;;  %v2288_v15 = vpop.permute.xlu0 %2287 }
 0xc0d   :  { %4356 = vmatpush3.xpose.msk.msra.mxu1 %vm221_vm2, %v2288_v15  ;;  %4357 = vmatprep.mubr.msk.f32.mxu1 %vm4714_vm1, %v4713_v34 }
 0xc0e   :  { %v2210_v16 = vpop.permute.xlu1 %2209  ;;  %4365 = vmatprep.subr.mxu1 %v4713_v34 }
 0xc0f   :  { %4351 = vmatpush3.xpose.msk.msra.mxu0 %vm221_vm2, %v2210_v16 }
 0xc10   :  { %v2286_v17 = vpop.permute.xlu0 %2285  ;;  %4360 = vmatprep.subr.mxu0 %v4713_v34 }
 0xc11   :  { %4358 = vmatmul.mubr.msk.f32.vlgmr.msra.gmra.mxu1 %vm221_vm2, %v2286_v17 }
 0xc12   :  { %4366 = vmatpush3.xpose.msk.msra.mxu1 %vm221_vm2, %v2443_v13  ;;  %v2208_v18 = vpop.permute.xlu1 %2207  ;;  %4367 = vmatprep.mubr.msk.f32.mxu1 %vm4714_vm1, %v4713_v34 }
 0xc13   :  { %4353 = vmatmul.mubr.msk.f32.vlgmr.msra.gmra.mxu0 %vm221_vm2, %v2208_v18  ;;  %4375 = vmatprep.subr.mxu1 %v4713_v34 }
 0xc14   :  { %4361 = vmatpush3.xpose.msk.msra.mxu0 %vm221_vm2, %v2365_v9  ;;  %v2521_v19 = vpop.permute.xlu0 %2520  ;;  %4362 = vmatprep.mubr.msk.f32.mxu0 %vm4714_vm1, %v4713_v34 }
 0xc15   :  { %4370 = vmatprep.subr.mxu0 %v4713_v34 }
 0xc16   :  { %v2441_v20 = vpop.permute.xlu1 %2440 }
 0xc17   :  { %4363 = vmatmul.mubr.msk.f32.vlgmr.msra.gmra.mxu0 %vm221_vm2, %v4985_v6  ;;  %4368 = vmatmul.mubr.msk.f32.vlgmr.msra.gmra.mxu1 %vm221_vm2, %v2441_v20 }
 0xc18   :  { %4371 = vmatpush3.xpose.msk.msra.mxu0 %vm221_vm2, %v2521_v19  ;;  %4372 = vmatprep.mubr.msk.f32.mxu0 %vm4714_vm1, %v4713_v34  ;;  %v2519_v21 = vpop.permute.xlu0 %2518 }
 0xc19   :  { %4377 = vmatprep.mubr.msk.f32.mxu1 %vm4714_vm1, %v4713_v34  ;;  %4380 = vmatprep.subr.mxu0 %v4713_v34 }
 0xc1a   :  { %v2599_v22 = vpop.permute.xlu1 %2598 }
 0xc1b   :  { %4373 = vmatmul.mubr.msk.f32.vlgmr.msra.gmra.mxu0 %vm221_vm2, %v2519_v21  ;;  %4376 = vmatpush3.xpose.msk.msra.mxu1 %vm221_vm2, %v2599_v22 }
 0xc1c   :  { %4385 = vmatprep.subr.mxu1 %v4713_v34  ;;  %4382 = vmatprep.mubr.msk.f32.mxu0 %vm4714_vm1, %v4713_v34 }
 0xc1e   :  { %v2597_v23 = vpop.permute.xlu1 %2596 }
 0xc1f   :  { %4378 = vmatmul.mubr.msk.f32.vlgmr.msra.gmra.mxu1 %vm221_vm2, %v2597_v23 }
 0xc20   :  { %4387 = vmatprep.mubr.msk.f32.mxu1 %vm4714_vm1, %v4713_v34 }
 0xcc8   :  { %v2125_v24 = vpop.f32.mrf.mxu1 }
 0xcc9   :  { %v2674_v25 = vadd.f32 %v2125_v24, %v4861_v60 }
 0xcca   :  { %v4344_v37 = vpop.f32.mrf.mxu1 }
 0xccb   :  { %v2682_v26 = vsel %vm221_vm2, %v2674_v25, -inf }
 0xccc   :  { %2683 = vmax.xlane.f32.xlu0 %v2682_v26  ;;  %v2203_v27 = vpop.f32.mrf.mxu1 }
 0xccd   :  { %v2675_v28 = vadd.f32 %v2203_v27, %v4861_v60 }
 0xcce   :  { %v4349_v29 = vpop.f32.mrf.mxu1 }
 0xccf   :  { %v2685_v30 = vsel %vm221_vm2, %v2675_v28, -inf }
 0xcd0   :  { %2686 = vmax.xlane.f32.xlu1 %v2685_v30 }
 0xcd1   :  { %v2359_v32 = vpop.f32.mrf.mxu1 }
 0xcd2   :  { %v2677_v40 = vadd.f32 %v2359_v32, %v4861_v60 }
 0xcd3   :  { %v2281_v35 = vpop.f32.mrf.mxu0  ;;  %v4359_v36 = vpop.f32.mrf.mxu1 }
 0xcd4   :  { %v2676_v38 = vadd.f32 %v2281_v35, %v4861_v60  ;;  %v2691_v39 = vsel %vm221_vm2, %v2677_v40, -inf }
 0xcd5   :  { %v4354_v33 = vpop.f32.mrf.mxu0 }
 0xcd6   :  { %v2688_v31 = vsel %vm221_vm2, %v2676_v38, -inf }
 0xcd7   :  { %v2436_v41 = vpop.f32.mrf.mxu0  ;;  %2689 = vmax.xlane.f32.xlu0 %v2688_v31  ;;  %v2514_v42 = vpop.f32.mrf.mxu1 }
 0xcd8   :  { %v2679_v43 = vadd.f32 %v2514_v42, %v4868_v10  ;;  %v2678_v46 = vadd.f32 %v2436_v41, %v4868_v10 }
 0xcd9   :  { %v4364_v44 = vpop.f32.mrf.mxu0  ;;  %v4369_v45 = vpop.f32.mrf.mxu1 }
 0xcda   :  { %v2697_v47 = vsel %vm221_vm2, %v2679_v43, -inf  ;;  %v2694_v50 = vsel %vm221_vm2, %v2678_v46, -inf }
 0xcdb   :  { %2692 = vmax.xlane.f32.xlu0 %v2691_v39  ;;  %2698 = vmax.xlane.f32.xlu1 %v2697_v47  ;;  %v2592_v48 = vpop.f32.mrf.mxu0 }
 0xcdc   :  { %v2680_v60 = vadd.f32 %v2592_v48, %v4868_v10 }
 0xcdd   :  { %v4374_v49 = vpop.f32.mrf.mxu0 }
 0xcde   :  { %v2700_v55 = vsel %vm221_vm2, %v2680_v60, -inf }
 0xcdf   :  { %2695 = vmax.xlane.f32.xlu0 %v2694_v50  ;;  %v2670_v51 = vpop.f32.mrf.mxu1 }
 0xce0   :  { %v2681_v52 = vadd.f32 %v2670_v51, %v4868_v10 }
 0xce1   :  { %v4379_v53 = vpop.f32.mrf.mxu1 }
 0xce2   :  { %v2703_v54 = vsel %vm221_vm2, %v2681_v52, -inf }
 0xce3   :  { %2704 = vmax.xlane.f32.xlu1 %v2703_v54  ;;  %2701 = vmax.xlane.f32.xlu0 %v2700_v55 }
 0xcf4   :  { %2846 = vrot.lane.b32.xlu1 %v4987_v8, %s4722_s14 }
 0xcf8   :  { %2922 = vrot.lane.b32.xlu1 %v4987_v8, %s4723_s15 }
 0xcf9   :  { %2770 = vrot.lane.b32.xlu0 %v4987_v8, %s4724_s16 }
 0xcfc   :  { %2998 = vrot.lane.b32.xlu1 %v4987_v8, %s4725_s17 }
 0xcfd   :  { %3089 = vrot.lane.b32.xlu0 %v4985_v6, %s4724_s16 }
 0xd00   :  { %3165 = vrot.lane.b32.xlu1 %v4985_v6, %s4722_s14 }
 0xd55   :  { %v2684_v10 = vpop.xlane.xlu0 %2683 }
 0xd56   :  { %v2706_v56 = vsub.f32 %v2674_v25, %v2684_v10 }
 0xd58   :  { %v2714_v57 = vmul.f32 1.442695, %v2706_v56 }
 0xd59   :  { %v2687_v58 = vpop.xlane.xlu1 %2686 }
 0xd5a   :  { %4553 = vpow2.f32 %v2714_v57  ;;  %v2707_v59 = vsub.f32 %v2675_v28, %v2687_v58 }
 0xd5c   :  { %v2716_v61 = vmul.f32 1.442695, %v2707_v59 }
 0xd5e   :  { %4555 = vpow2.f32 %v2716_v61 }
 0xd60   :  { %v2690_v62 = vpop.xlane.xlu0 %2689 }
 0xd61   :  { %v2708_v63 = vsub.f32 %v2676_v38, %v2690_v62 }
 0xd63   :  { %v2718_v0 = vmul.f32 1.442695, %v2708_v63 }
 0xd64   :  { %v2699_v1 = vpop.xlane.xlu1 %2698  ;;  %v2693_v4 = vpop.xlane.xlu0 %2692 }
 0xd65   :  { %4557 = vpow2.f32 %v2718_v0  ;;  %v2711_v5 = vsub.f32 %v2679_v43, %v2699_v1  ;;  %v2709_v7 = vsub.f32 %v2677_v40, %v2693_v4 }
 0xd67   :  { %v4554_v8 = vpop.eup %4553  ;;  %v2720_v9 = vmul.f32 1.442695, %v2709_v7  ;;  %v2724_v11 = vmul.f32 1.442695, %v2711_v5 }
 0xd68   :  { %v2696_v12 = vpop.xlane.xlu0 %2695  ;;  %v2730_v13 = vsel %vm221_vm2, %v4554_v8, 0.0 }
 0xd69   :  { %v2710_v14 = vsub.f32 %v2678_v46, %v2696_v12  ;;  %2731 = vadd.xlane.f32.xlu0 %v2730_v13  ;;  %4559 = vpow2.f32 %v2720_v9  ;;  %v3411_v9 = vld [vmem:[#allocation7 + $0xd8] sm:$0xff]  ;;  %v3410_v12 = vld [vmem:[#allocation7 + $0xd0] sm:$0xff]  ;;  %v3409_v13 = vld [vmem:[#allocation7 + $0xc8] sm:$0xff] }
 0xd6a   :  { %4561 = vpow2.f32 %v2724_v11 }
 0xd6b   :  { %v4556_v15 = vpop.eup %4555  ;;  %v2722_v16 = vmul.f32 1.442695, %v2710_v14 }
 0xd6c   :  { %v2705_v17 = vpop.xlane.xlu1 %2704  ;;  %v2702_v18 = vpop.xlane.xlu0 %2701  ;;  %v2733_v19 = vsel %vm221_vm2, %v4556_v15, 0.0 }
 0xd6d   :  { %4563 = vpow2.f32 %v2722_v16  ;;  %v2713_v20 = vsub.f32 %v2681_v52, %v2705_v17  ;;  %v2712_v21 = vsub.f32 %v2680_v60, %v2702_v18  ;;  %2734 = vadd.xlane.f32.xlu1 %v2733_v19 }
 0xd6f   :  { %v2728_v22 = vmul.f32 1.442695, %v2713_v20  ;;  %v2726_v23 = vmul.f32 1.442695, %v2712_v21 }
 0xd70   :  { %v2847_v24 = vpop.permute.xlu1 %2846  ;;  %v2771_v25 = vpop.permute.xlu0 %2770 }
 0xd71   :  { %4565 = vpow2.f32 %v2728_v22  ;;  %4381 = vmatpush3.msra.mxu0 %v2771_v25  ;;  %4386 = vmatpush3.msra.mxu1 %v2847_v24 }
 0xd72   :  { %v4558_v37 = vpop.eup %4557  ;;  %4567 = vpow2.f32 %v2726_v23  ;;  %4390 = vmatprep.subr.mxu0 %v4713_v34  ;;  %4395 = vmatprep.subr.mxu1 %v4713_v34 }
 0xd73   :  { %v2736_v26 = vsel %vm221_vm2, %v4558_v37, 0.0 }
 0xd74   :  { %2737 = vadd.xlane.f32.xlu0 %v2736_v26  ;;  %v2923_v31 = vpop.permute.xlu1 %2922  ;;  %v3090_v42 = vpop.permute.xlu0 %3089 }
 0xd76   :  { %v4560_v27 = vpop.eup %4559 }
 0xd77   :  { %v2739_v28 = vsel %vm221_vm2, %v4560_v27, 0.0  ;;  %v4562_v29 = vpop.eup %4561 }
 0xd78   :  { %2740 = vadd.xlane.f32.xlu1 %v2739_v28  ;;  %v2745_v35 = vsel %vm221_vm2, %v4562_v29, 0.0  ;;  %v2999_v41 = vpop.permute.xlu1 %2998 }
 0xd7a   :  { %v4564_v30 = vpop.eup %4563 }
 0xd7b   :  { %v2742_v32 = vsel %vm221_vm2, %v4564_v30, 0.0 }
 0xd7c   :  { %2743 = vadd.xlane.f32.xlu0 %v2742_v32  ;;  %2746 = vadd.xlane.f32.xlu1 %v2745_v35  ;;  %v3166_v43 = vpop.permute.xlu1 %3165 }
 0xd7e   :  { %v5095_v36 = vpop.eup %4565 }
 0xd7f   :  { %v5097_v38 = vpop.eup %4567  ;;  %v2751_v33 = vsel %vm221_vm2, %v5095_v36, 0.0 }
 0xd80   :  { %v2748_v40 = vsel %vm221_vm2, %v5097_v38, 0.0  ;;  %2752 = vadd.xlane.f32.xlu1 %v2751_v33 }
 0xd81   :  { %2749 = vadd.xlane.f32.xlu0 %v2748_v40 }
 0xd91   :  { %3317 = vrot.lane.b32.xlu1 %v4985_v6, %s4725_s17 }
 0xd97   :  { %3241 = vrot.lane.b32.xlu0 %v4985_v6, %s4723_s15 }
 0xdf2   :  { %v2732_v44 = vpop.xlane.xlu0 %2731 }
 0xdf3   :  { %4569 = vrcp.f32 %v2732_v44 }
 0xdf6   :  { %v2735_v45 = vpop.xlane.xlu1 %2734 }
 0xdf7   :  { %4571 = vrcp.f32 %v2735_v45 }
 0xdfd   :  { %v2738_v46 = vpop.xlane.xlu0 %2737 }
 0xdfe   :  { %4573 = vrcp.f32 %v2738_v46 }
 0xe00   :  { %v4570_v39 = vpop.eup %4569 }
 0xe01   :  { %v2762_v47 = vmul.f32 %v4570_v39, %v4554_v8  ;;  %v2741_v48 = vpop.xlane.xlu1 %2740 }
 0xe02   :  { %4575 = vrcp.f32 %v2741_v48 }
 0xe03   :  { %4383 = vmatmul.mubr.msk.f32.vlgmr.msra.gmra.mxu0 %vm221_vm2, %v2762_v47 }
 0xe04   :  { %v4572_v49 = vpop.eup %4571  ;;  %4391 = vmatpush3.msra.mxu0 %v2923_v31  ;;  %4392 = vmatprep.mubr.msk.f32.mxu0 %vm4714_vm1, %v4713_v34 }
 0xe05   :  { %v2744_v6 = vpop.xlane.xlu0 %2743  ;;  %v2763_v60 = vmul.f32 %v4572_v49, %v4556_v15  ;;  %4400 = vmatprep.subr.mxu0 %v4713_v34  ;;  %v2747_v50 = vpop.xlane.xlu1 %2746  ;;  %v3408_v15 = vld [vmem:[#allocation7 + $0xc0] sm:$0xff] }
 0xe06   :  { %4577 = vrcp.f32 %v2744_v6 }
 0xe07   :  { %4579 = vrcp.f32 %v2747_v50  ;;  %4388 = vmatmul.mubr.msk.f32.vlgmr.msra.gmra.mxu1 %vm221_vm2, %v2763_v60 }
 0xe08   :  { %4396 = vmatpush3.msra.mxu1 %v2999_v41  ;;  %4397 = vmatprep.mubr.msk.f32.mxu1 %vm4714_vm1, %v4713_v34  ;;  %v4052_v41 = vld [vmem:[#allocation8 + $0xb] ss:$0 sm:$0xff] }
 0xe09   :  { %4405 = vmatprep.subr.mxu1 %v4713_v34  ;;  %v2753_v51 = vpop.xlane.xlu1 %2752 }
 0xe0a   :  { %v2750_v52 = vpop.xlane.xlu0 %2749  ;;  %4581 = vrcp.f32 %v2753_v51 }
 0xe0b   :  { %v4574_v53 = vpop.eup %4573  ;;  %4583 = vrcp.f32 %v2750_v52 }
 0xe0c   :  { %v2764_v54 = vmul.f32 %v4574_v53, %v4558_v37 }
 0xe0d   :  { %v3318_v62 = vpop.permute.xlu1 %3317 }
 0xe0e   :  { %4393 = vmatmul.mubr.msk.f32.vlgmr.msra.gmra.mxu0 %vm221_vm2, %v2764_v54  ;;  %v3242_v61 = vpop.permute.xlu0 %3241 }
 0xe0f   :  { %4401 = vmatpush3.msra.mxu0 %v3090_v42  ;;  %4402 = vmatprep.mubr.msk.f32.mxu0 %vm4714_vm1, %v4713_v34  ;;  %v4576_v55 = vpop.eup %4575 }
 0xe10   :  { %4410 = vmatprep.subr.mxu0 %v4713_v34  ;;  %v2765_v10 = vmul.f32 %v4576_v55, %v4560_v27 }
 0xe12   :  { %4398 = vmatmul.mubr.msk.f32.vlgmr.msra.gmra.mxu1 %vm221_vm2, %v2765_v10  ;;  %v3544_v10 = vld [vmem:[#allocation7 + $0xf0] sm:$0xff] }
 0xe13   :  { %v4578_v56 = vpop.eup %4577  ;;  %4406 = vmatpush3.msra.mxu1 %v3166_v43  ;;  %4407 = vmatprep.mubr.msk.f32.mxu1 %vm4714_vm1, %v4713_v34 }
 0xe14   :  { %v4580_v57 = vpop.eup %4579  ;;  %v2766_v58 = vmul.f32 %v4578_v56, %v4564_v30  ;;  %4415 = vmatprep.subr.mxu1 %v4713_v34  ;;  %v3543_v56 = vld [vmem:[#allocation7 + $0xe8] sm:$0xff] }
 0xe15   :  { %v2767_v59 = vmul.f32 %v4580_v57, %v4562_v29  ;;  %v3542_v57 = vld [vmem:[#allocation7 + $0xe0] sm:$0xff] }
 0xe16   :  { %4403 = vmatmul.mubr.msk.f32.vlgmr.msra.gmra.mxu0 %vm221_vm2, %v2766_v58 }
 0xe17   :  { %4408 = vmatmul.mubr.msk.f32.vlgmr.msra.gmra.mxu1 %vm221_vm2, %v2767_v59  ;;  %4411 = vmatpush3.msra.mxu0 %v3242_v61  ;;  %v4582_v63 = vpop.eup %4581 }
 0xe18   :  { %4416 = vmatpush3.msra.mxu1 %v3318_v62  ;;  %4412 = vmatprep.mubr.msk.f32.mxu0 %vm4714_vm1, %v4713_v34  ;;  %v4584_v0 = vpop.eup %4583  ;;  %v2769_v1 = vmul.f32 %v4582_v63, %v5095_v36 }
 0xe19   :  { %4417 = vmatprep.mubr.msk.f32.mxu1 %vm4714_vm1, %v4713_v34  ;;  %v2768_v4 = vmul.f32 %v4584_v0, %v5097_v38  ;;  %4420 = vmatprep.subr.mxu0 %v3411_v9 }
 0xe1b   :  { %4418 = vmatmul.mubr.msk.f32.vlgmr.msra.gmra.mxu1 %vm221_vm2, %v2769_v1  ;;  %4413 = vmatmul.mubr.msk.f32.vlgmr.msra.gmra.mxu0 %vm221_vm2, %v2768_v4  ;;  %v4053_v4 = vld [vmem:[#allocation8 + $0xc] ss:$0 sm:$0xff] }
 0xe1c   :  { %4421 = vmatpush3.msra.mxu0 %v3411_v9 }
 0xe1d   :  { %4422 = vmatprep.subr.mxu0 %v3410_v12 }
 0xe1e   :  { %4423 = vmatpush3.msra.mxu0 %v3410_v12 }
 0xe1f   :  { %4424 = vmatprep.subr.mxu0 %v3409_v13 }
 0xe20   :  { %4425 = vmatpush3.msra.mxu0 %v3409_v13 }
 0xe21   :  { %4426 = vmatprep.subr.mxu0 %v3408_v15 }
 0xe22   :  { %4427 = vmatpush3.msra.mxu0 %v3408_v15  ;;  %v3659_v15 = vld [vmem:[#allocation7 + $0x138] sm:$0xff] }
 0xe23   :  { %4442 = vmatprep.subr.mxu0 %v3659_v15 }
 0xec3   :  { %v2842_v5 = vpop.f32.mrf.mxu0 }
 0xec5   :  { %v4384_v7 = vpop.f32.mrf.mxu0 }
 0xec6   :  { %v4054_v7 = vld [vmem:[#allocation8 + $0xd] ss:$0 sm:$0xff] }
 0xec7   :  { %v2918_v8 = vpop.f32.mrf.mxu1 }
 0xec8   :  { %3075 = vrot.lane.b32.xlu0 %v2918_v8, %s4710_s24 }
 0xec9   :  { %v4389_v11 = vpop.f32.mrf.mxu1 }
 0xece   :  { %v2994_v14 = vpop.f32.mrf.mxu0 }
 0xecf   :  { %3079 = vrot.lane.b32.xlu1 %v2994_v14, %s4726_s18 }
 0xed0   :  { %v4394_v16 = vpop.f32.mrf.mxu0 }
 0xed1   :  { %v3658_v16 = vld [vmem:[#allocation7 + $0x130] sm:$0xff] }
 0xed2   :  { %v3070_v17 = vpop.f32.mrf.mxu1 }
 0xed3   :  { %3083 = vrot.lane.b32.xlu1 %v3070_v17, %s4727_s19  ;;  %v3657_v17 = vld [vmem:[#allocation7 + $0x128] sm:$0xff] }
 0xed4   :  { %v4399_v18 = vpop.f32.mrf.mxu1 }
 0xed5   :  { %v3656_v18 = vld [vmem:[#allocation7 + $0x120] sm:$0xff] }
 0xed6   :  { %v3161_v19 = vpop.f32.mrf.mxu0 }
 0xed7   :  { %v3237_v20 = vpop.f32.mrf.mxu1 }
 0xed8   :  { %3394 = vrot.lane.b32.xlu0 %v3237_v20, %s4710_s24  ;;  %v4404_v21 = vpop.f32.mrf.mxu0  ;;  %v3654_v20 = vld [vmem:[#allocation7 + $0x110] sm:$0xff] }
 0xed9   :  { %v4409_v22 = vpop.f32.mrf.mxu1  ;;  %v3653_v21 = vld [vmem:[#allocation7 + $0x108] sm:$0xff] }
 0xeda   :  { %v3652_v22 = vld [vmem:[#allocation7 + $0x100] sm:$0xff] }
 0xedb   :  { %v3389_v23 = vpop.f32.mrf.mxu1  ;;  %v3313_v24 = vpop.f32.mrf.mxu0 }
 0xedc   :  { %3402 = vrot.lane.b32.xlu1 %v3389_v23, %s4727_s19  ;;  %3398 = vrot.lane.b32.xlu0 %v3313_v24, %s4726_s18  ;;  %v4057_v23 = vld [vmem:[#allocation8 + $0xe] ss:$0 sm:$0xff] }
 0xedd   :  { %v4419_v25 = vpop.f32.mrf.mxu1  ;;  %v4414_v37 = vpop.f32.mrf.mxu0 }
 0xf3a   :  { %v3076_v27 = vpop.permute.xlu0 %3075 }
 0xf3b   :  { %v3086_v28 = vsel %vm221_vm2, %v2842_v5, %v3076_v27 }
 0xf41   :  { %v3080_v26 = vpop.permute.xlu1 %3079 }
 0xf42   :  { %v3087_v29 = vsel %vm1254_vm3, %v3086_v28, %v3080_v26 }
 0xf45   :  { %v3084_v30 = vpop.permute.xlu1 %3083 }
 0xf46   :  { %v3088_v32 = vsel %vm1256_vm4, %v3087_v29, %v3084_v30 }
 0xf47   :  { %4428 = vmatprep.mubr.msk.f32.mxu0 %vm75_vm0, %v3088_v32 }
 0xf4a   :  { %v3395_v35 = vpop.permute.xlu0 %3394 }
 0xf4b   :  { %v3405_v38 = vsel %vm221_vm2, %v3161_v19, %v3395_v35  ;;  %v3655_v19 = vld [vmem:[#allocation7 + $0x118] sm:$0xff] }
 0xf4e   :  { %v3403_v36 = vpop.permute.xlu1 %3402  ;;  %v3399_v33 = vpop.permute.xlu0 %3398 }
 0xf4f   :  { %v3406_v40 = vsel %vm1254_vm3, %v3405_v38, %v3399_v33 }
 0xf50   :  { %v3407_v31 = vsel %vm1256_vm4, %v3406_v40, %v3403_v36 }
 0xf51   :  { %4429 = vmatmul.mubr.msk.f32.vlgmr.msra.gmra.mxu0 %vm75_vm0, %v3407_v31 }
 0xf52   :  { %4443 = vmatpush3.msra.mxu0 %v3659_v15 }
 0xf53   :  { %4444 = vmatprep.subr.mxu0 %v3658_v16 }
 0xf54   :  { %4445 = vmatpush3.msra.mxu0 %v3658_v16  ;;  %v4062_v16 = vld [vmem:[#allocation8 + $0x11] ss:$0 sm:$0xff] }
 0xf55   :  { %4446 = vmatprep.subr.mxu0 %v3657_v17 }
 0xf56   :  { %4447 = vmatpush3.msra.mxu0 %v3657_v17 }
 0xf57   :  { %4448 = vmatprep.subr.mxu0 %v3656_v18 }
 0xf58   :  { %4449 = vmatpush3.msra.mxu0 %v3656_v18 }
 0xf59   :  { %4450 = vmatprep.subr.mxu0 %v3655_v19 }
 0xf5a   :  { %4451 = vmatpush3.msra.mxu0 %v3655_v19 }
 0xf5b   :  { %4452 = vmatprep.subr.mxu0 %v3654_v20 }
 0xf5c   :  { %4453 = vmatpush3.msra.mxu0 %v3654_v20 }
 0xf5d   :  { %4454 = vmatprep.subr.mxu0 %v3653_v21 }
 0xf5e   :  { %4455 = vmatpush3.msra.mxu0 %v3653_v21 }
 0xf5f   :  { %4456 = vmatprep.subr.mxu0 %v3652_v22 }
 0xf60   :  { %4457 = vmatpush3.msra.mxu0 %v3652_v22 }
0x1011   :  { %v4430_v42 = vpop.f32.mrf.mxu0 }
0x1012   :  { %v3499_v43 = vadd.f32 %v4430_v42, %v4052_v41 }
0x1013   :  { %v3484_v44 = vpop.f32.mrf.mxu0 }
0x1014   :  { %v3501_v45 = vadd.f32 %v3499_v43, %v4977_v3  ;;  %v3498_v46 = vadd.f32 %v4052_v41, %v3484_v44 }
0x1016   :  { %v3500_v39 = vadd.f32 %v3498_v46, %v4975_v2  ;;  %v3507_v47 = vsel %vm75_vm0, %v3501_v45, 0.0  ;;  %v3545_v2 = vld [vmem:[#allocation7 + $0xf8] sm:$0xff] }
0x1017   :  { %3508 = vadd.xlane.f32.xlu1 %v3507_v47  ;;  %4431 = vmatprep.subr.mxu1 %v3545_v2  ;;  %v4060_v47 = vld [vmem:[#allocation8 + $0xf] ss:$0 sm:$0xff] }
0x1018   :  { %v3504_v48 = vsel %vm75_vm0, %v3500_v39, 0.0  ;;  %4432 = vmatpush3.msra.mxu1 %v3545_v2 }
0x1019   :  { %3505 = vadd.xlane.f32.xlu0 %v3504_v48  ;;  %4433 = vmatprep.subr.mxu1 %v3544_v10 }
0x101a   :  { %4434 = vmatpush3.msra.mxu1 %v3544_v10 }
0x101b   :  { %4435 = vmatprep.subr.mxu1 %v3543_v56 }
0x101c   :  { %4436 = vmatpush3.msra.mxu1 %v3543_v56 }
0x101d   :  { %4437 = vmatprep.subr.mxu1 %v3542_v57 }
0x101e   :  { %4438 = vmatpush3.msra.mxu1 %v3542_v57 }
0x101f   :  { %4461 = vmatprep.subr.mxu1 %v4713_v34 }
0x10a0   :  { %v3509_v49 = vpop.xlane.xlu1 %3508 }
0x10a1   :  { %v3511_v6 = vmul.f32 0.03125, %v3509_v49 }
0x10a2   :  { %v3506_v60 = vpop.xlane.xlu0 %3505 }
0x10a3   :  { %v3510_v50 = vmul.f32 0.03125, %v3506_v60  ;;  %v3513_v51 = vsub.f32 %v3501_v45, %v3511_v6 }
0x10a5   :  { %v3512_v52 = vsub.f32 %v3500_v39, %v3510_v50  ;;  %v3515_v55 = vmul.f32 %v3513_v51, %v3513_v51 }
0x10a7   :  { %v3514_v53 = vmul.f32 %v3512_v52, %v3512_v52  ;;  %v3519_v3 = vsel %vm75_vm0, %v3515_v55, 0.0 }
0x10a9   :  { %v3516_v54 = vsel %vm75_vm0, %v3514_v53, 0.0 }
0x10aa   :  { %3517 = vadd.xlane.f32.xlu0 %v3516_v54 }
0x10ae   :  { %3520 = vadd.xlane.f32.xlu0 %v3519_v3 }
0x1133   :  { %v3518_v58 = vpop.xlane.xlu0 %3517 }
0x1134   :  { %v3522_v59 = vmul.f32 0.03125, %v3518_v58 }
0x1136   :  { %v3524_v61 = vadd.f32 1e-12, %v3522_v59 }
0x1137   :  { %v3521_v62 = vpop.xlane.xlu0 %3520 }
0x1138   :  { %4585 = vrsqrt.f32 %v3524_v61  ;;  %v3523_v63 = vmul.f32 0.03125, %v3521_v62  ;;  %v3798_v62 = vld [vmem:[#allocation7 + $0x158] sm:$0xff] }
0x113a   :  { %v3525_v0 = vadd.f32 1e-12, %v3523_v63  ;;  %v3797_v63 = vld [vmem:[#allocation7 + $0x150] sm:$0xff] }
0x113c   :  { %4587 = vrsqrt.f32 %v3525_v0  ;;  %v3796_v0 = vld [vmem:[#allocation7 + $0x148] sm:$0xff] }
0x1145   :  { %v4586_v1 = vpop.eup %4585 }
0x1146   :  { %v3528_v5 = vmul.f32 %v4586_v1, %v3512_v52  ;;  %v3795_v1 = vld [vmem:[#allocation7 + $0x140] sm:$0xff] }
0x1148   :  { %v3534_v8 = vmul.f32 %v4053_v4, %v3528_v5 }
0x1149   :  { %v4588_v9 = vpop.eup %4587 }
0x114a   :  { %v3529_v11 = vmul.f32 %v4588_v9, %v3513_v51  ;;  %v5154_v12 = vadd.f32 %v4054_v7, %v3534_v8 }
0x114c   :  { %v3535_v13 = vmul.f32 %v4053_v4, %v3529_v11  ;;  %4439 = vmatprep.mubr.msk.f32.mxu1 %vm75_vm0, %v5154_v12 }
0x114e   :  { %v3541_v14 = vadd.f32 %v4054_v7, %v3535_v13  ;;  %v4061_v13 = vld [vmem:[#allocation8 + $0x10] ss:$0 sm:$0xff] }
0x1150   :  { %4440 = vmatmul.mubr.msk.f32.vlgmr.msra.gmra.mxu1 %vm75_vm0, %v3541_v14 }
0x1151   :  { %4469 = vmatprep.mubr.msk.f32.mxu1 %vm4714_vm1, %v4713_v34  ;;  %4462 = vmatpush3.msra.mxu1 %v3798_v62 }
0x1152   :  { %4463 = vmatprep.subr.mxu1 %v4713_v34 }
0x1153   :  { %4464 = vmatpush3.msra.mxu1 %v3797_v63 }
0x1154   :  { %4465 = vmatprep.subr.mxu1 %v4713_v34 }
0x1155   :  { %4466 = vmatpush3.msra.mxu1 %v3796_v0 }
0x1156   :  { %4467 = vmatprep.subr.mxu1 %v4713_v34 }
0x1157   :  { %4468 = vmatpush3.msra.mxu1 %v3795_v1 }
0x1158   :  { %4472 = vmatprep.subr.mxu1 %v4713_v34 }
0x1210   :  { %v4441_v24 = vpop.f32.mrf.mxu1 }
0x1211   :  { %v3633_v25 = vadd.f32 %v4441_v24, %v4057_v23  ;;  %v3882_v24 = vld [vmem:[#allocation7 + $0x178] sm:$0xff] }
0x1212   :  { %v3618_v37 = vpop.f32.mrf.mxu1 }
0x1213   :  { %v3635_v26 = vmul.f32 %v3633_v25, %v3633_v25  ;;  %v3632_v27 = vadd.f32 %v4057_v23, %v3618_v37  ;;  %v3880_v37 = vld [vmem:[#allocation7 + $0x168] sm:$0xff] }
0x1215   :  { %v3637_v28 = vmul.f32 %v3635_v26, %v3633_v25  ;;  %v3634_v29 = vmul.f32 %v3632_v27, %v3632_v27  ;;  %v3879_v26 = vld [vmem:[#allocation7 + $0x160] sm:$0xff] }
0x1217   :  { %v3639_v30 = vmul.f32 0.044715, %v3637_v28  ;;  %v3636_v32 = vmul.f32 %v3634_v29, %v3632_v27 }
0x1219   :  { %v3641_v35 = vadd.f32 %v3639_v30, %v3633_v25  ;;  %v3638_v36 = vmul.f32 0.044715, %v3636_v32 }
0x121b   :  { %v3643_v38 = vmul.f32 0.7978846, %v3641_v35  ;;  %v3640_v33 = vadd.f32 %v3638_v36, %v3632_v27  ;;  %v4066_v35 = vld [vmem:[#allocation8 + $0x13] ss:$0 sm:$0xff] }
0x121d   :  { %4589 = vtanh.f32 %v3643_v38  ;;  %v3642_v40 = vmul.f32 0.7978846, %v3640_v33 }
0x121f   :  { %4591 = vtanh.f32 %v3642_v40 }
0x122a   :  { %v4590_v31 = vpop.eup %4589 }
0x122b   :  { %v3647_v41 = vadd.f32 1.0, %v4590_v31 }
0x122c   :  { %v4592_v42 = vpop.eup %4591 }
0x122d   :  { %v3646_v43 = vadd.f32 1.0, %v4592_v42  ;;  %v3649_v44 = vmul.f32 0.5, %v3647_v41 }
0x122f   :  { %v3648_v45 = vmul.f32 0.5, %v3646_v43  ;;  %v3651_v39 = vmul.f32 %v3649_v44, %v3633_v25  ;;  %v3881_v25 = vld [vmem:[#allocation7 + $0x170] sm:$0xff] }
0x1231   :  { %v3650_v46 = vmul.f32 %v3648_v45, %v3632_v27  ;;  %v4064_v27 = vld [vmem:[#allocation8 + $0x12] ss:$0 sm:$0xff] }
0x1233   :  { %4458 = vmatprep.mubr.msk.f32.mxu0 %vm1829_vm5, %v3650_v46 }
0x1234   :  { %4459 = vmatmul.mubr.msk.f32.vlgmr.msra.gmra.mxu0 %vm1829_vm5, %v3651_v39 }
0x12f4   :  { %v4460_v48 = vpop.f32.mrf.mxu0 }
0x12f5   :  { %v3747_v49 = vadd.f32 %v4460_v48, %v4060_v47 }
0x12f6   :  { %v3732_v6 = vpop.f32.mrf.mxu0 }
0x12f7   :  { %v3749_v60 = vadd.f32 %v3747_v49, %v3541_v14  ;;  %v3746_v50 = vadd.f32 %v4060_v47, %v3732_v6 }
0x12f9   :  { %v3748_v51 = vadd.f32 %v3746_v50, %v5154_v12  ;;  %v3755_v52 = vsel %vm75_vm0, %v3749_v60, 0.0 }
0x12fa   :  { %3756 = vadd.xlane.f32.xlu0 %v3755_v52 }
0x12fb   :  { %v3752_v53 = vsel %vm75_vm0, %v3748_v51, 0.0 }
0x12fc   :  { %3753 = vadd.xlane.f32.xlu1 %v3752_v53 }
0x1383   :  { %v3757_v54 = vpop.xlane.xlu0 %3756 }
0x1384   :  { %v3759_v55 = vmul.f32 0.03125, %v3757_v54 }
0x1385   :  { %v3754_v3 = vpop.xlane.xlu1 %3753 }
0x1386   :  { %v3761_v2 = vsub.f32 %v3749_v60, %v3759_v55  ;;  %v3758_v10 = vmul.f32 0.03125, %v3754_v3 }
0x1388   :  { %v3760_v56 = vsub.f32 %v3748_v51, %v3758_v10  ;;  %v3763_v57 = vmul.f32 %v3761_v2, %v3761_v2 }
0x138a   :  { %v3767_v58 = vsel %vm75_vm0, %v3763_v57, 0.0  ;;  %v3762_v59 = vmul.f32 %v3760_v56, %v3760_v56 }
0x138b   :  { %3768 = vadd.xlane.f32.xlu0 %v3767_v58 }
0x138c   :  { %v3764_v61 = vsel %vm75_vm0, %v3762_v59, 0.0 }
0x138d   :  { %3765 = vadd.xlane.f32.xlu1 %v3764_v61 }
0x1414   :  { %v3769_v4 = vpop.xlane.xlu0 %3768 }
0x1415   :  { %v3771_v5 = vmul.f32 0.03125, %v3769_v4 }
0x1416   :  { %v3766_v7 = vpop.xlane.xlu1 %3765 }
0x1417   :  { %v3773_v8 = vadd.f32 1e-12, %v3771_v5  ;;  %v3770_v9 = vmul.f32 0.03125, %v3766_v7 }
0x1419   :  { %4593 = vrsqrt.f32 %v3773_v8  ;;  %v3772_v11 = vadd.f32 1e-12, %v3770_v9 }
0x141b   :  { %4595 = vrsqrt.f32 %v3772_v11 }
0x1426   :  { %v4594_v12 = vpop.eup %4593 }
0x1427   :  { %v3777_v14 = vmul.f32 %v4594_v12, %v3761_v2 }
0x1428   :  { %v4596_v15 = vpop.eup %4595 }
0x1429   :  { %v3776_v17 = vmul.f32 %v4596_v15, %v3760_v56  ;;  %v3783_v18 = vmul.f32 %v4061_v13, %v3777_v14 }
0x142b   :  { %v3782_v19 = vmul.f32 %v4061_v13, %v3776_v17  ;;  %v3789_v20 = vadd.f32 %v4062_v16, %v3783_v18 }
0x142d   :  { %v3788_v21 = vadd.f32 %v4062_v16, %v3782_v19  ;;  %v3791_v22 = vrot.slane %v3789_v20, 7 }
0x142f   :  { %v3794_v23 = vsel %vm3793_vm6, %v3788_v21, %v3791_v22 }
0x1430   :  { %4470 = vmatmul.mubr.msk.f32.vlgmr.msra.gmra.mxu1 %vm75_vm0, %v3794_v23 }
0x1431   :  { %4480 = vmatprep.mubr.msk.f32.mxu1 %vm4714_vm1, %v4713_v34  ;;  %4473 = vmatpush3.msra.mxu1 %v3882_v24 }
0x1432   :  { %4474 = vmatprep.subr.mxu1 %v4713_v34 }
0x1433   :  { %4475 = vmatpush3.msra.mxu1 %v3881_v25 }
0x1434   :  { %4476 = vmatprep.subr.mxu1 %v4713_v34 }
0x1435   :  { %4477 = vmatpush3.msra.mxu1 %v3880_v37 }
0x1436   :  { %4478 = vmatprep.subr.mxu1 %v4713_v34 }
0x1437   :  { %4479 = vmatpush3.msra.mxu1 %v3879_v26 }
0x14f0   :  { %v3868_v28 = vpop.f32.mrf.mxu1 }
0x14f1   :  { %v3877_v29 = vadd.f32 %v4064_v27, %v3868_v28 }
0x14f2   :  { %v4471_v30 = vpop.f32.mrf.mxu1 }
0x14f3   :  { %4597 = vtanh.f32 %v3877_v29 }
0x1500   :  { %v4598_v32 = vpop.eup %4597 }
0x1501   :  { %4481 = vmatmul.mubr.msk.f32.vlgmr.msra.gmra.mxu1 %vm75_vm0, %v4598_v32 }
0x15c1   :  { %v3952_v36 = vpop.f32.mrf.mxu1 }
0x15c2   :  { %v3961_v38 = vadd.f32 %v4066_v35, %v3952_v36 }
0x15c3   :  { %v4482_v33 = vpop.f32.mrf.mxu1 }
0x15c4   :  { %3963 = vst.msk [vmem:[#allocation10] sm:$0x3] %vm3962_vm7, %v3961_v38 }
0x15c5   :  { %4690 = shalt.err (!%p4687_p10)
}
0x15c6   :  { %3973 = dma.vmem_to_hbm [thread:$0]  %s3971_s21, 32, %s5186_s4, [#allocation4]  }
0x15c7   :  { %4705 = dma.done.wait [#allocation4], 32  }
0x15c8   :  { %4706 = vsyncadd [#allocation4], 4294967264 }
0x15c9   :  { %3977 = vsyncpa [#allocation3], 1 }
0x15ca   :  { %3978 = vsyncpa [#allocation6], 1 }
0x15cb   :  { %3979 = vsyncpa [#allocation9], 1 }
0x15cc   :  { %3980 = vsyncpa [#allocation4], 1 }

</bundles_post_ra>
